<compile_context>
chip_gen: v7x
topology: tpu7x:2x2x1
jax: 0.10.0
libtpu: 0.0.40
codegen_flags: <defaults>
</compile_context>

<pallas_src>
import jax
import jax.numpy as jnp
from jax import lax
from jax.experimental import pallas as pl
from jax.experimental.pallas import tpu as pltpu


def _round_up_128(n):
    return ((n + 127) // 128) * 128


def deeprec_kernel(
    seq_ref,      # (S*B, E)   time-major flat item-history embeddings (row t*B+b)
    user_ref,     # (B, E)
    item_ref,     # (B, E)
    mask_ref,     # (S*B, 1)   1.0 where t < length else 0.0 (row t*B+b)
    w_ih_ref,     # (E, Gp)    GRU input weights (transposed), gates [r,z,n], lane-padded
    w_hh_ref,     # (H, Gp)    GRU hidden weights (transposed), lane-padded
    b_ih_ref,     # (1, Gp)
    b_hh_ref,     # (1, Gp)
    wq_ref,       # (H, Ap)    attention query_layer (requires E == H)
    bq_ref,       # (1, Ap)
    wk_ref,       # (H, Ap)    attention key_layer
    bk_ref,       # (1, Ap)
    we_ref,       # (Ap, 1)    attention energy_layer column (no bias), zero-padded rows
    w1_ref,       # (2E+H, D1p) MLP linear_0
    b1_ref,       # (1, D1p)
    w2_ref,       # (D1p, D2p)  MLP linear_1 (zero-padded K rows and N cols)
    b2_ref,       # (1, D2p)
    wo_ref,       # (D2p, 1)    output_layer (zero-padded K rows)
    bo_ref,       # (1, 1)
    out_ref,      # (B, 1)      sigmoid prediction
    gru_ref,      # scratch VMEM (S*B, H) — flat GRU outputs
    mlpin_ref,    # scratch VMEM (B, 2E+H) — concat(user, item, context)
):
    SB, E = seq_ref.shape
    B = user_ref.shape[0]
    S = SB // B
    H = w_hh_ref.shape[0]

    w_hh = w_hh_ref[...]
    b_hh = b_hh_ref[...]

    # ---- GRU: hoisted input projection (single big MXU call) ---------------
    gi_all = (jnp.dot(seq_ref[...], w_ih_ref[...],
                      preferred_element_type=jnp.float32) + b_ih_ref[...])   # (S*B, Gp)

    # ---- GRU recurrence, fully unrolled (PyTorch nn.GRU equations) ---------
    h = jnp.zeros((B, H), jnp.float32)
    for t in range(S):
        lo = t * B
        gi = gi_all[lo:lo + B]                                               # (B, Gp)
        gh = jnp.dot(h, w_hh, preferred_element_type=jnp.float32) + b_hh     # (B, Gp)
        r = jax.nn.sigmoid(gi[:, :H] + gh[:, :H])
        z = jax.nn.sigmoid(gi[:, H:2 * H] + gh[:, H:2 * H])
        n = jnp.tanh(gi[:, 2 * H:3 * H] + r * gh[:, 2 * H:3 * H])
        h = (1.0 - z) * n + z * h
        gru_ref[lo:lo + B, :] = h                                            # static slice store

    outs = gru_ref[...]                                                      # (S*B, H), no reshape

    # ---- Attention over GRU outputs -----------------------------------------
    q = (jnp.dot(item_ref[...], wq_ref[...],
                 preferred_element_type=jnp.float32) + bq_ref[...])          # (B, Ap)
    k = (jnp.dot(outs, wk_ref[...],
                 preferred_element_type=jnp.float32) + bk_ref[...])          # (S*B, Ap)
    q_b = jnp.concatenate([q] * S, axis=0)                                   # (S*B, Ap)
    qk = jnp.tanh(q_b + k)                                                   # (S*B, Ap)

    # energy reduction on the MXU instead of an XLU cross-lane sum
    scores = jnp.dot(qk, we_ref[...], preferred_element_type=jnp.float32)    # (S*B, 1)
    scores = jnp.where(mask_ref[...] > 0.0, scores, jnp.float32(-1e9))

    # masked softmax over time in the flat layout (unrolled, static slices)
    m = scores[0:B]
    for t in range(1, S):
        m = jnp.maximum(m, scores[t * B:(t + 1) * B])
    es = [jnp.exp(scores[t * B:(t + 1) * B] - m) for t in range(S)]          # S x (B, 1)
    denom = es[0]
    for t in range(1, S):
        denom = denom + es[t]
    inv = pl.reciprocal(denom, approx=True)                                  # EUP slot

    context = (es[0] * inv) * outs[0:B]
    for t in range(1, S):
        context = context + (es[t] * inv) * outs[t * B:(t + 1) * B]          # (B, H)

    # ---- MLP head: one concat scratch, one matmul per layer ----------------
    mlpin_ref[:, :E] = user_ref[...]
    mlpin_ref[:, E:2 * E] = item_ref[...]
    mlpin_ref[:, 2 * E:] = context

    h1 = jnp.dot(mlpin_ref[...], w1_ref[...],
                 preferred_element_type=jnp.float32) + b1_ref[...]
    h1 = jnp.maximum(h1, 0.0)                                                # (B, D1p)
    h2 = jnp.dot(h1, w2_ref[...],
                 preferred_element_type=jnp.float32) + b2_ref[...]
    h2 = jnp.maximum(h2, 0.0)                                                # (B, D2p)
    logit = jnp.dot(h2, wo_ref[...],
                    preferred_element_type=jnp.float32) + bo_ref[...]        # (B, 1)
    out_ref[...] = jax.nn.sigmoid(logit)


def prep_params(p):
    """Zero-pad weight lane (N) dims to 128 so all intermediates are lane-dense.

    Padded columns/rows are exact zeros, so they flow through tanh/sigmoid/relu
    math without changing the result — no slicing-back needed in the kernel.
    """
    E, G = p["w_ih_t"].shape          # G = 3H
    H = p["w_hh_t"].shape[0]
    A = p["wq_t"].shape[1]
    Min, D1 = p["w1_t"].shape
    D2 = p["w2_t"].shape[1]
    Gp, Ap, D1p, D2p = map(_round_up_128, (G, A, D1, D2))

    def pad2(a, rows, cols):
        return jnp.pad(a, ((0, rows - a.shape[0]), (0, cols - a.shape[1])))

    return {
        "w_ih": pad2(p["w_ih_t"], E, Gp),
        "w_hh": pad2(p["w_hh_t"], H, Gp),
        "b_ih": pad2(p["b_ih"], 1, Gp),
        "b_hh": pad2(p["b_hh"], 1, Gp),
        "wq": pad2(p["wq_t"], H, Ap),
        "bq": pad2(p["bq"], 1, Ap),
        "wk": pad2(p["wk_t"], H, Ap),
        "bk": pad2(p["bk"], 1, Ap),
        "we": pad2(p["we"].T, Ap, 1),      # (A,1) column, zero-padded rows
        "w1": pad2(p["w1_t"], Min, D1p),
        "b1": pad2(p["b1"], 1, D1p),
        "w2": pad2(p["w2_t"], D1p, D2p),   # zero-padded K rows + N cols
        "b2": pad2(p["b2"], 1, D2p),
        "wo": pad2(p["wo_t"], D2p, 1),     # zero-padded K rows
        "bo": p["bo"],
    }


def deeprec_pallas(seq_embed_bt, user_embed, item_embed, mask_bt, p):
    B, S, E = seq_embed_bt.shape
    H = p["w_hh_t"].shape[0]

    # layout plumbing in the wrapper: time-major flat (row index = t*B + b)
    seq_flat = jnp.transpose(seq_embed_bt, (1, 0, 2)).reshape(S * B, E)
    mask_flat = jnp.transpose(mask_bt, (1, 0)).reshape(S * B, 1)

    kp = prep_params(p)
    n_in = 19
    vmem_spec = pl.BlockSpec(memory_space=pltpu.MemorySpace.VMEM)

    return pl.pallas_call(
        deeprec_kernel,
        out_shape=jax.ShapeDtypeStruct((B, 1), jnp.float32),
        in_specs=[vmem_spec] * n_in,
        out_specs=vmem_spec,
        scratch_shapes=[
            pltpu.VMEM((S * B, H), jnp.float32),       # flat GRU outputs
            pltpu.VMEM((B, 2 * E + H), jnp.float32),   # MLP concat input
        ],
    )(seq_flat, user_embed, item_embed, mask_flat,
      kp["w_ih"], kp["w_hh"], kp["b_ih"], kp["b_hh"],
      kp["wq"], kp["bq"], kp["wk"], kp["bk"], kp["we"],
      kp["w1"], kp["b1"], kp["w2"], kp["b2"], kp["wo"], kp["bo"])


# ---------------------------- pure-JAX reference -----------------------------
def deeprec_reference(seq_embed_bt, user_embed, item_embed, mask_bt, p):
    B, S, E = seq_embed_bt.shape
    H = p["w_hh_t"].shape[0]

    def step(h, x_t):
        gi = x_t @ p["w_ih_t"] + p["b_ih"]
        gh = h @ p["w_hh_t"] + p["b_hh"]
        r = jax.nn.sigmoid(gi[:, :H] + gh[:, :H])
        z = jax.nn.sigmoid(gi[:, H:2 * H] + gh[:, H:2 * H])
        n = jnp.tanh(gi[:, 2 * H:] + r * gh[:, 2 * H:])
        h_new = (1.0 - z) * n + z * h
        return h_new, h_new

    _, outs = lax.scan(step, jnp.zeros((B, H), jnp.float32),
                       jnp.transpose(seq_embed_bt, (1, 0, 2)))
    outs = jnp.transpose(outs, (1, 0, 2))                             # (B, S, H)

    q = item_embed @ p["wq_t"] + p["bq"]                              # (B, A)
    k = outs @ p["wk_t"] + p["bk"]                                    # (B, S, A)
    qk = jnp.tanh(q[:, None, :] + k)
    scores = jnp.sum(qk * p["we"][None, :, :], axis=-1)               # (B, S)
    scores = jnp.where(mask_bt > 0.0, scores, -1000000000.0)
    attn = jax.nn.softmax(scores, axis=1)
    ctx = jnp.einsum("bs,bsh->bh", attn, outs)

    mlp_in = jnp.concatenate([user_embed, item_embed, ctx], axis=1)
    h1 = jnp.maximum(mlp_in @ p["w1_t"] + p["b1"], 0.0)
    h2 = jnp.maximum(h1 @ p["w2_t"] + p["b2"], 0.0)
    return jax.nn.sigmoid(h2 @ p["wo_t"] + p["bo"])


# ------------------------------ parameter init -------------------------------
def xavier_normal(key, fan_in, fan_out):
    std = (2.0 / (fan_in + fan_out)) ** 0.5
    return jax.random.normal(key, (fan_in, fan_out), jnp.float32) * std


def init_params(key, E, H, A, mlp_dims):
    ks = jax.random.split(key, 16)
    k = 1.0 / (H ** 0.5)
    mlp_in = 2 * E + H
    d1, d2 = mlp_dims
    return {
        # GRU (uniform(-1/sqrt(H), 1/sqrt(H)) like PyTorch's default)
        "w_ih_t": jax.random.uniform(ks[0], (E, 3 * H), jnp.float32, -k, k),
        "w_hh_t": jax.random.uniform(ks[1], (H, 3 * H), jnp.float32, -k, k),
        "b_ih": jax.random.uniform(ks[2], (1, 3 * H), jnp.float32, -k, k),
        "b_hh": jax.random.uniform(ks[3], (1, 3 * H), jnp.float32, -k, k),
        # Attention (xavier-normal weights, small-uniform biases as in nn.Linear)
        "wq_t": xavier_normal(ks[4], H, A),
        "bq": jax.random.uniform(ks[5], (1, A), jnp.float32, -k, k),
        "wk_t": xavier_normal(ks[6], H, A),
        "bk": jax.random.uniform(ks[7], (1, A), jnp.float32, -k, k),
        "we": xavier_normal(ks[8], 1, A),          # (1, A), no bias
        # MLP
        "w1_t": xavier_normal(ks[9], mlp_in, d1),
        "b1": jax.random.uniform(ks[10], (1, d1), jnp.float32, -0.05, 0.05),
        "w2_t": xavier_normal(ks[11], d1, d2),
        "b2": jax.random.uniform(ks[12], (1, d2), jnp.float32, -0.05, 0.05),
        "wo_t": xavier_normal(ks[13], d2, 1),
        "bo": jax.random.uniform(ks[14], (1, 1), jnp.float32, -0.05, 0.05),
    }


if __name__ == "__main__":
    # Small shapes. Model requires embed_dim == hidden_dim (see header note).
    B, S = 8, 8
    E = H = 32
    A = 32
    MLP_DIMS = [64, 32]
    NUM_USERS, NUM_ITEMS = 50, 100   # field_dims = [50, 100]

    root = jax.random.PRNGKey(0)
    k_emb_u, k_emb_i, k_x, k_seq, k_par = jax.random.split(root, 5)

    # Embedding tables (normal, std=0.01, like nn.init.normal_)
    emb_user = jax.random.normal(k_emb_u, (NUM_USERS, E), jnp.float32) * 0.01
    emb_item = jax.random.normal(k_emb_i, (NUM_ITEMS, E), jnp.float32) * 0.01

    # Inputs: x (B, 2) categorical ids, seq_x (B, S), seq_lengths (B,)
    x = jax.random.randint(k_x, (B, 2), 1, NUM_USERS)
    seq_x = jax.random.randint(k_seq, (B, S), 1, NUM_ITEMS)
    seq_lengths = jnp.array([8, 5, 3, 8, 1, 6, 8, 2], dtype=jnp.int32)

    params = init_params(k_par, E, H, A, MLP_DIMS)

    # ------------------------ JAX glue (embedding gathers) -------------------
    user_embed = jnp.take(emb_user, x[:, 0], axis=0)                  # (B, E)
    item_embed = jnp.take(emb_item, x[:, 1], axis=0)                  # (B, E)
    mask_bt = (jnp.arange(S)[None, :] < seq_lengths[:, None]).astype(jnp.float32)
    seq_embed_bt = jnp.take(emb_item, seq_x, axis=0) * mask_bt[:, :, None]

    pred = deeprec_pallas(seq_embed_bt, user_embed, item_embed, mask_bt, params)
    pred = jax.block_until_ready(pred)

    ref = deeprec_reference(seq_embed_bt, user_embed, item_embed, mask_bt, params)
    ref = jax.block_until_ready(ref)

    assert pred.shape == (B, 1)
    # Slightly looser tolerance than f32-exact because the softmax denominator
    # uses pl.reciprocal(approx=True) (EUP vrcp) in the kernel.
    assert jnp.allclose(pred, ref, rtol=1e-3, atol=1e-4), (pred, ref)
    print("KERNEL_OK")
</pallas_src>

<mosaic_0001>
module attributes {stable_mosaic.version = 11 : i64} {
  func.func @deeprec_kernel(%arg0: memref<64x32xf32, #tpu.memory_space<vmem>>, %arg1: memref<8x32xf32, #tpu.memory_space<vmem>>, %arg2: memref<8x32xf32, #tpu.memory_space<vmem>>, %arg3: memref<64x1xf32, #tpu.memory_space<vmem>>, %arg4: memref<32x128xf32, #tpu.memory_space<vmem>>, %arg5: memref<32x128xf32, #tpu.memory_space<vmem>>, %arg6: memref<1x128xf32, #tpu.memory_space<vmem>>, %arg7: memref<1x128xf32, #tpu.memory_space<vmem>>, %arg8: memref<32x128xf32, #tpu.memory_space<vmem>>, %arg9: memref<1x128xf32, #tpu.memory_space<vmem>>, %arg10: memref<32x128xf32, #tpu.memory_space<vmem>>, %arg11: memref<1x128xf32, #tpu.memory_space<vmem>>, %arg12: memref<128x1xf32, #tpu.memory_space<vmem>>, %arg13: memref<96x128xf32, #tpu.memory_space<vmem>>, %arg14: memref<1x128xf32, #tpu.memory_space<vmem>>, %arg15: memref<128x128xf32, #tpu.memory_space<vmem>>, %arg16: memref<1x128xf32, #tpu.memory_space<vmem>>, %arg17: memref<128x1xf32, #tpu.memory_space<vmem>>, %arg18: memref<1x1xf32, #tpu.memory_space<vmem>>, %arg19: memref<8x1xf32, #tpu.memory_space<vmem>>, %arg20: memref<64x32xf32, #tpu.memory_space<vmem>>, %arg21: memref<8x96xf32, #tpu.memory_space<vmem>>) attributes {dimension_semantics = [], scalar_prefetch = 0 : i64, scratch_operands = 2 : i64, tpu.core_type = #tpu.core_type<tc>} {
    %c0 = arith.constant 0 : index
    %c0_0 = arith.constant 0 : index
    %0 = vector.load %arg5[%c0, %c0_0] : memref<32x128xf32, #tpu.memory_space<vmem>>, vector<32x128xf32>
    %c0_1 = arith.constant 0 : index
    %c0_2 = arith.constant 0 : index
    %1 = vector.load %arg7[%c0_1, %c0_2] : memref<1x128xf32, #tpu.memory_space<vmem>>, vector<1x128xf32>
    %c0_3 = arith.constant 0 : index
    %c0_4 = arith.constant 0 : index
    %2 = vector.load %arg0[%c0_3, %c0_4] : memref<64x32xf32, #tpu.memory_space<vmem>>, vector<64x32xf32>
    %c0_5 = arith.constant 0 : index
    %c0_6 = arith.constant 0 : index
    %3 = vector.load %arg4[%c0_5, %c0_6] : memref<32x128xf32, #tpu.memory_space<vmem>>, vector<32x128xf32>
    %cst = arith.constant dense<0.000000e+00> : vector<64x128xf32>
    %4 = tpu.matmul %2, %3, %cst {dimension_numbers = #tpu.dot_dimension_numbers<[1], [0], [0], [1], [0, 0, 1, 1], [], []>} : vector<64x32xf32>, vector<32x128xf32>, vector<64x128xf32> -> vector<64x128xf32>
    %c0_7 = arith.constant 0 : index
    %c0_8 = arith.constant 0 : index
    %5 = vector.load %arg6[%c0_7, %c0_8] : memref<1x128xf32, #tpu.memory_space<vmem>>, vector<1x128xf32>
    %6 = vector.broadcast %5 : vector<1x128xf32> to vector<64x128xf32>
    %7 = arith.addf %4, %6 : vector<64x128xf32>
    %cst_9 = arith.constant 0.000000e+00 : f32
    %8 = vector.broadcast %cst_9 : f32 to vector<8x32xf32>
    %9 = vector.extract_strided_slice %7 {offsets = [0, 0], sizes = [8, 128], strides = [1, 1]} : vector<64x128xf32> to vector<8x128xf32>
    %cst_10 = arith.constant dense<0.000000e+00> : vector<8x128xf32>
    %10 = tpu.matmul %8, %0, %cst_10 {dimension_numbers = #tpu.dot_dimension_numbers<[1], [0], [0], [1], [0, 0, 1, 1], [], []>} : vector<8x32xf32>, vector<32x128xf32>, vector<8x128xf32> -> vector<8x128xf32>
    %11 = vector.broadcast %1 : vector<1x128xf32> to vector<8x128xf32>
    %12 = arith.addf %10, %11 : vector<8x128xf32>
    %13 = vector.extract_strided_slice %9 {offsets = [0, 0], sizes = [8, 32], strides = [1, 1]} : vector<8x128xf32> to vector<8x32xf32>
    %14 = vector.extract_strided_slice %12 {offsets = [0, 0], sizes = [8, 32], strides = [1, 1]} : vector<8x128xf32> to vector<8x32xf32>
    %15 = arith.addf %13, %14 : vector<8x32xf32>
    %16 = arith.negf %15 : vector<8x32xf32>
    %17 = math.exp %16 : vector<8x32xf32>
    %cst_11 = arith.constant 1.000000e+00 : f32
    %18 = vector.broadcast %cst_11 : f32 to vector<8x32xf32>
    %19 = arith.addf %18, %17 : vector<8x32xf32>
    %20 = arith.divf %18, %19 : vector<8x32xf32>
    %21 = vector.extract_strided_slice %9 {offsets = [0, 32], sizes = [8, 32], strides = [1, 1]} : vector<8x128xf32> to vector<8x32xf32>
    %22 = vector.extract_strided_slice %12 {offsets = [0, 32], sizes = [8, 32], strides = [1, 1]} : vector<8x128xf32> to vector<8x32xf32>
    %23 = arith.addf %21, %22 : vector<8x32xf32>
    %24 = arith.negf %23 : vector<8x32xf32>
    %25 = math.exp %24 : vector<8x32xf32>
    %cst_12 = arith.constant 1.000000e+00 : f32
    %26 = vector.broadcast %cst_12 : f32 to vector<8x32xf32>
    %27 = arith.addf %26, %25 : vector<8x32xf32>
    %28 = arith.divf %26, %27 : vector<8x32xf32>
    %29 = vector.extract_strided_slice %9 {offsets = [0, 64], sizes = [8, 32], strides = [1, 1]} : vector<8x128xf32> to vector<8x32xf32>
    %30 = vector.extract_strided_slice %12 {offsets = [0, 64], sizes = [8, 32], strides = [1, 1]} : vector<8x128xf32> to vector<8x32xf32>
    %31 = arith.mulf %20, %30 : vector<8x32xf32>
    %32 = arith.addf %29, %31 : vector<8x32xf32>
    %33 = math.tanh %32 : vector<8x32xf32>
    %cst_13 = arith.constant 1.000000e+00 : f32
    %34 = vector.broadcast %cst_13 : f32 to vector<8x32xf32>
    %35 = arith.subf %34, %28 : vector<8x32xf32>
    %36 = arith.mulf %35, %33 : vector<8x32xf32>
    %37 = arith.mulf %28, %8 : vector<8x32xf32>
    %38 = arith.addf %36, %37 : vector<8x32xf32>
    %c0_14 = arith.constant 0 : index
    %c0_15 = arith.constant 0 : index
    %39 = vector.load %arg20[%c0_14, %c0_15] : memref<64x32xf32, #tpu.memory_space<vmem>>, vector<8x32xf32>
    tpu.vector_store %arg20[%c0_14, %c0_15], %38 {strides = array<i32>} : memref<64x32xf32, #tpu.memory_space<vmem>>, vector<8x32xf32>,
    %40 = vector.extract_strided_slice %7 {offsets = [8, 0], sizes = [8, 128], strides = [1, 1]} : vector<64x128xf32> to vector<8x128xf32>
    %cst_16 = arith.constant dense<0.000000e+00> : vector<8x128xf32>
    %41 = tpu.matmul %38, %0, %cst_16 {dimension_numbers = #tpu.dot_dimension_numbers<[1], [0], [0], [1], [0, 0, 1, 1], [], []>} : vector<8x32xf32>, vector<32x128xf32>, vector<8x128xf32> -> vector<8x128xf32>
    %42 = vector.broadcast %1 : vector<1x128xf32> to vector<8x128xf32>
    %43 = arith.addf %41, %42 : vector<8x128xf32>
    %44 = vector.extract_strided_slice %40 {offsets = [0, 0], sizes = [8, 32], strides = [1, 1]} : vector<8x128xf32> to vector<8x32xf32>
    %45 = vector.extract_strided_slice %43 {offsets = [0, 0], sizes = [8, 32], strides = [1, 1]} : vector<8x128xf32> to vector<8x32xf32>
    %46 = arith.addf %44, %45 : vector<8x32xf32>
    %47 = arith.negf %46 : vector<8x32xf32>
    %48 = math.exp %47 : vector<8x32xf32>
    %cst_17 = arith.constant 1.000000e+00 : f32
    %49 = vector.broadcast %cst_17 : f32 to vector<8x32xf32>
    %50 = arith.addf %49, %48 : vector<8x32xf32>
    %51 = arith.divf %49, %50 : vector<8x32xf32>
    %52 = vector.extract_strided_slice %40 {offsets = [0, 32], sizes = [8, 32], strides = [1, 1]} : vector<8x128xf32> to vector<8x32xf32>
    %53 = vector.extract_strided_slice %43 {offsets = [0, 32], sizes = [8, 32], strides = [1, 1]} : vector<8x128xf32> to vector<8x32xf32>
    %54 = arith.addf %52, %53 : vector<8x32xf32>
    %55 = arith.negf %54 : vector<8x32xf32>
    %56 = math.exp %55 : vector<8x32xf32>
    %cst_18 = arith.constant 1.000000e+00 : f32
    %57 = vector.broadcast %cst_18 : f32 to vector<8x32xf32>
    %58 = arith.addf %57, %56 : vector<8x32xf32>
    %59 = arith.divf %57, %58 : vector<8x32xf32>
    %60 = vector.extract_strided_slice %40 {offsets = [0, 64], sizes = [8, 32], strides = [1, 1]} : vector<8x128xf32> to vector<8x32xf32>
    %61 = vector.extract_strided_slice %43 {offsets = [0, 64], sizes = [8, 32], strides = [1, 1]} : vector<8x128xf32> to vector<8x32xf32>
    %62 = arith.mulf %51, %61 : vector<8x32xf32>
    %63 = arith.addf %60, %62 : vector<8x32xf32>
    %64 = math.tanh %63 : vector<8x32xf32>
    %cst_19 = arith.constant 1.000000e+00 : f32
    %65 = vector.broadcast %cst_19 : f32 to vector<8x32xf32>
    %66 = arith.subf %65, %59 : vector<8x32xf32>
    %67 = arith.mulf %66, %64 : vector<8x32xf32>
    %68 = arith.mulf %59, %38 : vector<8x32xf32>
    %69 = arith.addf %67, %68 : vector<8x32xf32>
    %c8 = arith.constant 8 : index
    %c0_20 = arith.constant 0 : index
    %70 = vector.load %arg20[%c8, %c0_20] : memref<64x32xf32, #tpu.memory_space<vmem>>, vector<8x32xf32>
    tpu.vector_store %arg20[%c8, %c0_20], %69 {strides = array<i32>} : memref<64x32xf32, #tpu.memory_space<vmem>>, vector<8x32xf32>,
    %71 = vector.extract_strided_slice %7 {offsets = [16, 0], sizes = [8, 128], strides = [1, 1]} : vector<64x128xf32> to vector<8x128xf32>
    %cst_21 = arith.constant dense<0.000000e+00> : vector<8x128xf32>
    %72 = tpu.matmul %69, %0, %cst_21 {dimension_numbers = #tpu.dot_dimension_numbers<[1], [0], [0], [1], [0, 0, 1, 1], [], []>} : vector<8x32xf32>, vector<32x128xf32>, vector<8x128xf32> -> vector<8x128xf32>
    %73 = vector.broadcast %1 : vector<1x128xf32> to vector<8x128xf32>
    %74 = arith.addf %72, %73 : vector<8x128xf32>
    %75 = vector.extract_strided_slice %71 {offsets = [0, 0], sizes = [8, 32], strides = [1, 1]} : vector<8x128xf32> to vector<8x32xf32>
    %76 = vector.extract_strided_slice %74 {offsets = [0, 0], sizes = [8, 32], strides = [1, 1]} : vector<8x128xf32> to vector<8x32xf32>
    %77 = arith.addf %75, %76 : vector<8x32xf32>
    %78 = arith.negf %77 : vector<8x32xf32>
    %79 = math.exp %78 : vector<8x32xf32>
    %cst_22 = arith.constant 1.000000e+00 : f32
    %80 = vector.broadcast %cst_22 : f32 to vector<8x32xf32>
    %81 = arith.addf %80, %79 : vector<8x32xf32>
    %82 = arith.divf %80, %81 : vector<8x32xf32>
    %83 = vector.extract_strided_slice %71 {offsets = [0, 32], sizes = [8, 32], strides = [1, 1]} : vector<8x128xf32> to vector<8x32xf32>
    %84 = vector.extract_strided_slice %74 {offsets = [0, 32], sizes = [8, 32], strides = [1, 1]} : vector<8x128xf32> to vector<8x32xf32>
    %85 = arith.addf %83, %84 : vector<8x32xf32>
    %86 = arith.negf %85 : vector<8x32xf32>
    %87 = math.exp %86 : vector<8x32xf32>
    %cst_23 = arith.constant 1.000000e+00 : f32
    %88 = vector.broadcast %cst_23 : f32 to vector<8x32xf32>
    %89 = arith.addf %88, %87 : vector<8x32xf32>
    %90 = arith.divf %88, %89 : vector<8x32xf32>
    %91 = vector.extract_strided_slice %71 {offsets = [0, 64], sizes = [8, 32], strides = [1, 1]} : vector<8x128xf32> to vector<8x32xf32>
    %92 = vector.extract_strided_slice %74 {offsets = [0, 64], sizes = [8, 32], strides = [1, 1]} : vector<8x128xf32> to vector<8x32xf32>
    %93 = arith.mulf %82, %92 : vector<8x32xf32>
    %94 = arith.addf %91, %93 : vector<8x32xf32>
    %95 = math.tanh %94 : vector<8x32xf32>
    %cst_24 = arith.constant 1.000000e+00 : f32
    %96 = vector.broadcast %cst_24 : f32 to vector<8x32xf32>
    %97 = arith.subf %96, %90 : vector<8x32xf32>
    %98 = arith.mulf %97, %95 : vector<8x32xf32>
    %99 = arith.mulf %90, %69 : vector<8x32xf32>
    %100 = arith.addf %98, %99 : vector<8x32xf32>
    %c16 = arith.constant 16 : index
    %c0_25 = arith.constant 0 : index
    %101 = vector.load %arg20[%c16, %c0_25] : memref<64x32xf32, #tpu.memory_space<vmem>>, vector<8x32xf32>
    tpu.vector_store %arg20[%c16, %c0_25], %100 {strides = array<i32>} : memref<64x32xf32, #tpu.memory_space<vmem>>, vector<8x32xf32>,
    %102 = vector.extract_strided_slice %7 {offsets = [24, 0], sizes = [8, 128], strides = [1, 1]} : vector<64x128xf32> to vector<8x128xf32>
    %cst_26 = arith.constant dense<0.000000e+00> : vector<8x128xf32>
    %103 = tpu.matmul %100, %0, %cst_26 {dimension_numbers = #tpu.dot_dimension_numbers<[1], [0], [0], [1], [0, 0, 1, 1], [], []>} : vector<8x32xf32>, vector<32x128xf32>, vector<8x128xf32> -> vector<8x128xf32>
    %104 = vector.broadcast %1 : vector<1x128xf32> to vector<8x128xf32>
    %105 = arith.addf %103, %104 : vector<8x128xf32>
    %106 = vector.extract_strided_slice %102 {offsets = [0, 0], sizes = [8, 32], strides = [1, 1]} : vector<8x128xf32> to vector<8x32xf32>
    %107 = vector.extract_strided_slice %105 {offsets = [0, 0], sizes = [8, 32], strides = [1, 1]} : vector<8x128xf32> to vector<8x32xf32>
    %108 = arith.addf %106, %107 : vector<8x32xf32>
    %109 = arith.negf %108 : vector<8x32xf32>
    %110 = math.exp %109 : vector<8x32xf32>
    %cst_27 = arith.constant 1.000000e+00 : f32
    %111 = vector.broadcast %cst_27 : f32 to vector<8x32xf32>
    %112 = arith.addf %111, %110 : vector<8x32xf32>
    %113 = arith.divf %111, %112 : vector<8x32xf32>
    %114 = vector.extract_strided_slice %102 {offsets = [0, 32], sizes = [8, 32], strides = [1, 1]} : vector<8x128xf32> to vector<8x32xf32>
    %115 = vector.extract_strided_slice %105 {offsets = [0, 32], sizes = [8, 32], strides = [1, 1]} : vector<8x128xf32> to vector<8x32xf32>
    %116 = arith.addf %114, %115 : vector<8x32xf32>
    %117 = arith.negf %116 : vector<8x32xf32>
    %118 = math.exp %117 : vector<8x32xf32>
    %cst_28 = arith.constant 1.000000e+00 : f32
    %119 = vector.broadcast %cst_28 : f32 to vector<8x32xf32>
    %120 = arith.addf %119, %118 : vector<8x32xf32>
    %121 = arith.divf %119, %120 : vector<8x32xf32>
    %122 = vector.extract_strided_slice %102 {offsets = [0, 64], sizes = [8, 32], strides = [1, 1]} : vector<8x128xf32> to vector<8x32xf32>
    %123 = vector.extract_strided_slice %105 {offsets = [0, 64], sizes = [8, 32], strides = [1, 1]} : vector<8x128xf32> to vector<8x32xf32>
    %124 = arith.mulf %113, %123 : vector<8x32xf32>
    %125 = arith.addf %122, %124 : vector<8x32xf32>
    %126 = math.tanh %125 : vector<8x32xf32>
    %cst_29 = arith.constant 1.000000e+00 : f32
    %127 = vector.broadcast %cst_29 : f32 to vector<8x32xf32>
    %128 = arith.subf %127, %121 : vector<8x32xf32>
    %129 = arith.mulf %128, %126 : vector<8x32xf32>
    %130 = arith.mulf %121, %100 : vector<8x32xf32>
    %131 = arith.addf %129, %130 : vector<8x32xf32>
    %c24 = arith.constant 24 : index
    %c0_30 = arith.constant 0 : index
    %132 = vector.load %arg20[%c24, %c0_30] : memref<64x32xf32, #tpu.memory_space<vmem>>, vector<8x32xf32>
    tpu.vector_store %arg20[%c24, %c0_30], %131 {strides = array<i32>} : memref<64x32xf32, #tpu.memory_space<vmem>>, vector<8x32xf32>,
    %133 = vector.extract_strided_slice %7 {offsets = [32, 0], sizes = [8, 128], strides = [1, 1]} : vector<64x128xf32> to vector<8x128xf32>
    %cst_31 = arith.constant dense<0.000000e+00> : vector<8x128xf32>
    %134 = tpu.matmul %131, %0, %cst_31 {dimension_numbers = #tpu.dot_dimension_numbers<[1], [0], [0], [1], [0, 0, 1, 1], [], []>} : vector<8x32xf32>, vector<32x128xf32>, vector<8x128xf32> -> vector<8x128xf32>
    %135 = vector.broadcast %1 : vector<1x128xf32> to vector<8x128xf32>
    %136 = arith.addf %134, %135 : vector<8x128xf32>
    %137 = vector.extract_strided_slice %133 {offsets = [0, 0], sizes = [8, 32], strides = [1, 1]} : vector<8x128xf32> to vector<8x32xf32>
    %138 = vector.extract_strided_slice %136 {offsets = [0, 0], sizes = [8, 32], strides = [1, 1]} : vector<8x128xf32> to vector<8x32xf32>
    %139 = arith.addf %137, %138 : vector<8x32xf32>
    %140 = arith.negf %139 : vector<8x32xf32>
    %141 = math.exp %140 : vector<8x32xf32>
    %cst_32 = arith.constant 1.000000e+00 : f32
    %142 = vector.broadcast %cst_32 : f32 to vector<8x32xf32>
    %143 = arith.addf %142, %141 : vector<8x32xf32>
    %144 = arith.divf %142, %143 : vector<8x32xf32>
    %145 = vector.extract_strided_slice %133 {offsets = [0, 32], sizes = [8, 32], strides = [1, 1]} : vector<8x128xf32> to vector<8x32xf32>
    %146 = vector.extract_strided_slice %136 {offsets = [0, 32], sizes = [8, 32], strides = [1, 1]} : vector<8x128xf32> to vector<8x32xf32>
    %147 = arith.addf %145, %146 : vector<8x32xf32>
    %148 = arith.negf %147 : vector<8x32xf32>
    %149 = math.exp %148 : vector<8x32xf32>
    %cst_33 = arith.constant 1.000000e+00 : f32
    %150 = vector.broadcast %cst_33 : f32 to vector<8x32xf32>
    %151 = arith.addf %150, %149 : vector<8x32xf32>
    %152 = arith.divf %150, %151 : vector<8x32xf32>
    %153 = vector.extract_strided_slice %133 {offsets = [0, 64], sizes = [8, 32], strides = [1, 1]} : vector<8x128xf32> to vector<8x32xf32>
    %154 = vector.extract_strided_slice %136 {offsets = [0, 64], sizes = [8, 32], strides = [1, 1]} : vector<8x128xf32> to vector<8x32xf32>
    %155 = arith.mulf %144, %154 : vector<8x32xf32>
    %156 = arith.addf %153, %155 : vector<8x32xf32>
    %157 = math.tanh %156 : vector<8x32xf32>
    %cst_34 = arith.constant 1.000000e+00 : f32
    %158 = vector.broadcast %cst_34 : f32 to vector<8x32xf32>
    %159 = arith.subf %158, %152 : vector<8x32xf32>
    %160 = arith.mulf %159, %157 : vector<8x32xf32>
    %161 = arith.mulf %152, %131 : vector<8x32xf32>
    %162 = arith.addf %160, %161 : vector<8x32xf32>
    %c32 = arith.constant 32 : index
    %c0_35 = arith.constant 0 : index
    %163 = vector.load %arg20[%c32, %c0_35] : memref<64x32xf32, #tpu.memory_space<vmem>>, vector<8x32xf32>
    tpu.vector_store %arg20[%c32, %c0_35], %162 {strides = array<i32>} : memref<64x32xf32, #tpu.memory_space<vmem>>, vector<8x32xf32>,
    %164 = vector.extract_strided_slice %7 {offsets = [40, 0], sizes = [8, 128], strides = [1, 1]} : vector<64x128xf32> to vector<8x128xf32>
    %cst_36 = arith.constant dense<0.000000e+00> : vector<8x128xf32>
    %165 = tpu.matmul %162, %0, %cst_36 {dimension_numbers = #tpu.dot_dimension_numbers<[1], [0], [0], [1], [0, 0, 1, 1], [], []>} : vector<8x32xf32>, vector<32x128xf32>, vector<8x128xf32> -> vector<8x128xf32>
    %166 = vector.broadcast %1 : vector<1x128xf32> to vector<8x128xf32>
    %167 = arith.addf %165, %166 : vector<8x128xf32>
    %168 = vector.extract_strided_slice %164 {offsets = [0, 0], sizes = [8, 32], strides = [1, 1]} : vector<8x128xf32> to vector<8x32xf32>
    %169 = vector.extract_strided_slice %167 {offsets = [0, 0], sizes = [8, 32], strides = [1, 1]} : vector<8x128xf32> to vector<8x32xf32>
    %170 = arith.addf %168, %169 : vector<8x32xf32>
    %171 = arith.negf %170 : vector<8x32xf32>
    %172 = math.exp %171 : vector<8x32xf32>
    %cst_37 = arith.constant 1.000000e+00 : f32
    %173 = vector.broadcast %cst_37 : f32 to vector<8x32xf32>
    %174 = arith.addf %173, %172 : vector<8x32xf32>
    %175 = arith.divf %173, %174 : vector<8x32xf32>
    %176 = vector.extract_strided_slice %164 {offsets = [0, 32], sizes = [8, 32], strides = [1, 1]} : vector<8x128xf32> to vector<8x32xf32>
    %177 = vector.extract_strided_slice %167 {offsets = [0, 32], sizes = [8, 32], strides = [1, 1]} : vector<8x128xf32> to vector<8x32xf32>
    %178 = arith.addf %176, %177 : vector<8x32xf32>
    %179 = arith.negf %178 : vector<8x32xf32>
    %180 = math.exp %179 : vector<8x32xf32>
    %cst_38 = arith.constant 1.000000e+00 : f32
    %181 = vector.broadcast %cst_38 : f32 to vector<8x32xf32>
    %182 = arith.addf %181, %180 : vector<8x32xf32>
    %183 = arith.divf %181, %182 : vector<8x32xf32>
    %184 = vector.extract_strided_slice %164 {offsets = [0, 64], sizes = [8, 32], strides = [1, 1]} : vector<8x128xf32> to vector<8x32xf32>
    %185 = vector.extract_strided_slice %167 {offsets = [0, 64], sizes = [8, 32], strides = [1, 1]} : vector<8x128xf32> to vector<8x32xf32>
    %186 = arith.mulf %175, %185 : vector<8x32xf32>
    %187 = arith.addf %184, %186 : vector<8x32xf32>
    %188 = math.tanh %187 : vector<8x32xf32>
    %cst_39 = arith.constant 1.000000e+00 : f32
    %189 = vector.broadcast %cst_39 : f32 to vector<8x32xf32>
    %190 = arith.subf %189, %183 : vector<8x32xf32>
    %191 = arith.mulf %190, %188 : vector<8x32xf32>
    %192 = arith.mulf %183, %162 : vector<8x32xf32>
    %193 = arith.addf %191, %192 : vector<8x32xf32>
    %c40 = arith.constant 40 : index
    %c0_40 = arith.constant 0 : index
    %194 = vector.load %arg20[%c40, %c0_40] : memref<64x32xf32, #tpu.memory_space<vmem>>, vector<8x32xf32>
    tpu.vector_store %arg20[%c40, %c0_40], %193 {strides = array<i32>} : memref<64x32xf32, #tpu.memory_space<vmem>>, vector<8x32xf32>,
    %195 = vector.extract_strided_slice %7 {offsets = [48, 0], sizes = [8, 128], strides = [1, 1]} : vector<64x128xf32> to vector<8x128xf32>
    %cst_41 = arith.constant dense<0.000000e+00> : vector<8x128xf32>
    %196 = tpu.matmul %193, %0, %cst_41 {dimension_numbers = #tpu.dot_dimension_numbers<[1], [0], [0], [1], [0, 0, 1, 1], [], []>} : vector<8x32xf32>, vector<32x128xf32>, vector<8x128xf32> -> vector<8x128xf32>
    %197 = vector.broadcast %1 : vector<1x128xf32> to vector<8x128xf32>
    %198 = arith.addf %196, %197 : vector<8x128xf32>
    %199 = vector.extract_strided_slice %195 {offsets = [0, 0], sizes = [8, 32], strides = [1, 1]} : vector<8x128xf32> to vector<8x32xf32>
    %200 = vector.extract_strided_slice %198 {offsets = [0, 0], sizes = [8, 32], strides = [1, 1]} : vector<8x128xf32> to vector<8x32xf32>
    %201 = arith.addf %199, %200 : vector<8x32xf32>
    %202 = arith.negf %201 : vector<8x32xf32>
    %203 = math.exp %202 : vector<8x32xf32>
    %cst_42 = arith.constant 1.000000e+00 : f32
    %204 = vector.broadcast %cst_42 : f32 to vector<8x32xf32>
    %205 = arith.addf %204, %203 : vector<8x32xf32>
    %206 = arith.divf %204, %205 : vector<8x32xf32>
    %207 = vector.extract_strided_slice %195 {offsets = [0, 32], sizes = [8, 32], strides = [1, 1]} : vector<8x128xf32> to vector<8x32xf32>
    %208 = vector.extract_strided_slice %198 {offsets = [0, 32], sizes = [8, 32], strides = [1, 1]} : vector<8x128xf32> to vector<8x32xf32>
    %209 = arith.addf %207, %208 : vector<8x32xf32>
    %210 = arith.negf %209 : vector<8x32xf32>
    %211 = math.exp %210 : vector<8x32xf32>
    %cst_43 = arith.constant 1.000000e+00 : f32
    %212 = vector.broadcast %cst_43 : f32 to vector<8x32xf32>
    %213 = arith.addf %212, %211 : vector<8x32xf32>
    %214 = arith.divf %212, %213 : vector<8x32xf32>
    %215 = vector.extract_strided_slice %195 {offsets = [0, 64], sizes = [8, 32], strides = [1, 1]} : vector<8x128xf32> to vector<8x32xf32>
    %216 = vector.extract_strided_slice %198 {offsets = [0, 64], sizes = [8, 32], strides = [1, 1]} : vector<8x128xf32> to vector<8x32xf32>
    %217 = arith.mulf %206, %216 : vector<8x32xf32>
    %218 = arith.addf %215, %217 : vector<8x32xf32>
    %219 = math.tanh %218 : vector<8x32xf32>
    %cst_44 = arith.constant 1.000000e+00 : f32
    %220 = vector.broadcast %cst_44 : f32 to vector<8x32xf32>
    %221 = arith.subf %220, %214 : vector<8x32xf32>
    %222 = arith.mulf %221, %219 : vector<8x32xf32>
    %223 = arith.mulf %214, %193 : vector<8x32xf32>
    %224 = arith.addf %222, %223 : vector<8x32xf32>
    %c48 = arith.constant 48 : index
    %c0_45 = arith.constant 0 : index
    %225 = vector.load %arg20[%c48, %c0_45] : memref<64x32xf32, #tpu.memory_space<vmem>>, vector<8x32xf32>
    tpu.vector_store %arg20[%c48, %c0_45], %224 {strides = array<i32>} : memref<64x32xf32, #tpu.memory_space<vmem>>, vector<8x32xf32>,
    %226 = vector.extract_strided_slice %7 {offsets = [56, 0], sizes = [8, 128], strides = [1, 1]} : vector<64x128xf32> to vector<8x128xf32>
    %cst_46 = arith.constant dense<0.000000e+00> : vector<8x128xf32>
    %227 = tpu.matmul %224, %0, %cst_46 {dimension_numbers = #tpu.dot_dimension_numbers<[1], [0], [0], [1], [0, 0, 1, 1], [], []>} : vector<8x32xf32>, vector<32x128xf32>, vector<8x128xf32> -> vector<8x128xf32>
    %228 = vector.broadcast %1 : vector<1x128xf32> to vector<8x128xf32>
    %229 = arith.addf %227, %228 : vector<8x128xf32>
    %230 = vector.extract_strided_slice %226 {offsets = [0, 0], sizes = [8, 32], strides = [1, 1]} : vector<8x128xf32> to vector<8x32xf32>
    %231 = vector.extract_strided_slice %229 {offsets = [0, 0], sizes = [8, 32], strides = [1, 1]} : vector<8x128xf32> to vector<8x32xf32>
    %232 = arith.addf %230, %231 : vector<8x32xf32>
    %233 = arith.negf %232 : vector<8x32xf32>
    %234 = math.exp %233 : vector<8x32xf32>
    %cst_47 = arith.constant 1.000000e+00 : f32
    %235 = vector.broadcast %cst_47 : f32 to vector<8x32xf32>
    %236 = arith.addf %235, %234 : vector<8x32xf32>
    %237 = arith.divf %235, %236 : vector<8x32xf32>
    %238 = vector.extract_strided_slice %226 {offsets = [0, 32], sizes = [8, 32], strides = [1, 1]} : vector<8x128xf32> to vector<8x32xf32>
    %239 = vector.extract_strided_slice %229 {offsets = [0, 32], sizes = [8, 32], strides = [1, 1]} : vector<8x128xf32> to vector<8x32xf32>
    %240 = arith.addf %238, %239 : vector<8x32xf32>
    %241 = arith.negf %240 : vector<8x32xf32>
    %242 = math.exp %241 : vector<8x32xf32>
    %cst_48 = arith.constant 1.000000e+00 : f32
    %243 = vector.broadcast %cst_48 : f32 to vector<8x32xf32>
    %244 = arith.addf %243, %242 : vector<8x32xf32>
    %245 = arith.divf %243, %244 : vector<8x32xf32>
    %246 = vector.extract_strided_slice %226 {offsets = [0, 64], sizes = [8, 32], strides = [1, 1]} : vector<8x128xf32> to vector<8x32xf32>
    %247 = vector.extract_strided_slice %229 {offsets = [0, 64], sizes = [8, 32], strides = [1, 1]} : vector<8x128xf32> to vector<8x32xf32>
    %248 = arith.mulf %237, %247 : vector<8x32xf32>
    %249 = arith.addf %246, %248 : vector<8x32xf32>
    %250 = math.tanh %249 : vector<8x32xf32>
    %cst_49 = arith.constant 1.000000e+00 : f32
    %251 = vector.broadcast %cst_49 : f32 to vector<8x32xf32>
    %252 = arith.subf %251, %245 : vector<8x32xf32>
    %253 = arith.mulf %252, %250 : vector<8x32xf32>
    %254 = arith.mulf %245, %224 : vector<8x32xf32>
    %255 = arith.addf %253, %254 : vector<8x32xf32>
    %c56 = arith.constant 56 : index
    %c0_50 = arith.constant 0 : index
    %256 = vector.load %arg20[%c56, %c0_50] : memref<64x32xf32, #tpu.memory_space<vmem>>, vector<8x32xf32>
    tpu.vector_store %arg20[%c56, %c0_50], %255 {strides = array<i32>} : memref<64x32xf32, #tpu.memory_space<vmem>>, vector<8x32xf32>,
    %c0_51 = arith.constant 0 : index
    %c0_52 = arith.constant 0 : index
    %257 = vector.load %arg20[%c0_51, %c0_52] : memref<64x32xf32, #tpu.memory_space<vmem>>, vector<64x32xf32>
    %c0_53 = arith.constant 0 : index
    %c0_54 = arith.constant 0 : index
    %258 = vector.load %arg2[%c0_53, %c0_54] : memref<8x32xf32, #tpu.memory_space<vmem>>, vector<8x32xf32>
    %c0_55 = arith.constant 0 : index
    %c0_56 = arith.constant 0 : index
    %259 = vector.load %arg8[%c0_55, %c0_56] : memref<32x128xf32, #tpu.memory_space<vmem>>, vector<32x128xf32>
    %cst_57 = arith.constant dense<0.000000e+00> : vector<8x128xf32>
    %260 = tpu.matmul %258, %259, %cst_57 {dimension_numbers = #tpu.dot_dimension_numbers<[1], [0], [0], [1], [0, 0, 1, 1], [], []>} : vector<8x32xf32>, vector<32x128xf32>, vector<8x128xf32> -> vector<8x128xf32>
    %c0_58 = arith.constant 0 : index
    %c0_59 = arith.constant 0 : index
    %261 = vector.load %arg9[%c0_58, %c0_59] : memref<1x128xf32, #tpu.memory_space<vmem>>, vector<1x128xf32>
    %262 = vector.broadcast %261 : vector<1x128xf32> to vector<8x128xf32>
    %263 = arith.addf %260, %262 : vector<8x128xf32>
    %c0_60 = arith.constant 0 : index
    %c0_61 = arith.constant 0 : index
    %264 = vector.load %arg10[%c0_60, %c0_61] : memref<32x128xf32, #tpu.memory_space<vmem>>, vector<32x128xf32>
    %cst_62 = arith.constant dense<0.000000e+00> : vector<64x128xf32>
    %265 = tpu.matmul %257, %264, %cst_62 {dimension_numbers = #tpu.dot_dimension_numbers<[1], [0], [0], [1], [0, 0, 1, 1], [], []>} : vector<64x32xf32>, vector<32x128xf32>, vector<64x128xf32> -> vector<64x128xf32>
    %c0_63 = arith.constant 0 : index
    %c0_64 = arith.constant 0 : index
    %266 = vector.load %arg11[%c0_63, %c0_64] : memref<1x128xf32, #tpu.memory_space<vmem>>, vector<1x128xf32>
    %267 = vector.broadcast %266 : vector<1x128xf32> to vector<64x128xf32>
    %268 = arith.addf %265, %267 : vector<64x128xf32>
    %269 = tpu.concatenate %263, %263, %263, %263, %263, %263, %263, %263 in 0 : vector<8x128xf32>, vector<8x128xf32>, vector<8x128xf32>, vector<8x128xf32>, vector<8x128xf32>, vector<8x128xf32>, vector<8x128xf32>, vector<8x128xf32> -> vector<64x128xf32>
    %270 = arith.addf %269, %268 : vector<64x128xf32>
    %271 = math.tanh %270 : vector<64x128xf32>
    %c0_65 = arith.constant 0 : index
    %c0_66 = arith.constant 0 : index
    %272 = vector.load %arg12[%c0_65, %c0_66] : memref<128x1xf32, #tpu.memory_space<vmem>>, vector<128x1xf32>
    %cst_67 = arith.constant dense<0.000000e+00> : vector<64x1xf32>
    %273 = tpu.matmul %271, %272, %cst_67 {dimension_numbers = #tpu.dot_dimension_numbers<[1], [0], [0], [1], [0, 0, 1, 1], [], []>} : vector<64x128xf32>, vector<128x1xf32>, vector<64x1xf32> -> vector<64x1xf32>
    %c0_68 = arith.constant 0 : index
    %c0_69 = arith.constant 0 : index
    %274 = vector.load %arg3[%c0_68, %c0_69] : memref<64x1xf32, #tpu.memory_space<vmem>>, vector<64x1xf32>
    %cst_70 = arith.constant 0.000000e+00 : f32
    %275 = vector.broadcast %cst_70 : f32 to vector<64x1xf32>
    %276 = arith.cmpf ogt, %274, %275 : vector<64x1xf32>
    %cst_71 = arith.constant -1.000000e+09 : f32
    %277 = vector.broadcast %cst_71 : f32 to vector<64x1xf32>
    %278 = arith.select %276, %273, %277 : vector<64x1xi1>, vector<64x1xf32>
    %279 = vector.extract_strided_slice %278 {offsets = [0, 0], sizes = [8, 1], strides = [1, 1]} : vector<64x1xf32> to vector<8x1xf32>
    %280 = vector.extract_strided_slice %278 {offsets = [8, 0], sizes = [8, 1], strides = [1, 1]} : vector<64x1xf32> to vector<8x1xf32>
    %281 = arith.maximumf %279, %280 : vector<8x1xf32>
    %282 = vector.extract_strided_slice %278 {offsets = [16, 0], sizes = [8, 1], strides = [1, 1]} : vector<64x1xf32> to vector<8x1xf32>
    %283 = arith.maximumf %281, %282 : vector<8x1xf32>
    %284 = vector.extract_strided_slice %278 {offsets = [24, 0], sizes = [8, 1], strides = [1, 1]} : vector<64x1xf32> to vector<8x1xf32>
    %285 = arith.maximumf %283, %284 : vector<8x1xf32>
    %286 = vector.extract_strided_slice %278 {offsets = [32, 0], sizes = [8, 1], strides = [1, 1]} : vector<64x1xf32> to vector<8x1xf32>
    %287 = arith.maximumf %285, %286 : vector<8x1xf32>
    %288 = vector.extract_strided_slice %278 {offsets = [40, 0], sizes = [8, 1], strides = [1, 1]} : vector<64x1xf32> to vector<8x1xf32>
    %289 = arith.maximumf %287, %288 : vector<8x1xf32>
    %290 = vector.extract_strided_slice %278 {offsets = [48, 0], sizes = [8, 1], strides = [1, 1]} : vector<64x1xf32> to vector<8x1xf32>
    %291 = arith.maximumf %289, %290 : vector<8x1xf32>
    %292 = vector.extract_strided_slice %278 {offsets = [56, 0], sizes = [8, 1], strides = [1, 1]} : vector<64x1xf32> to vector<8x1xf32>
    %293 = arith.maximumf %291, %292 : vector<8x1xf32>
    %294 = vector.extract_strided_slice %278 {offsets = [0, 0], sizes = [8, 1], strides = [1, 1]} : vector<64x1xf32> to vector<8x1xf32>
    %295 = arith.subf %294, %293 : vector<8x1xf32>
    %296 = math.exp %295 : vector<8x1xf32>
    %297 = vector.extract_strided_slice %278 {offsets = [8, 0], sizes = [8, 1], strides = [1, 1]} : vector<64x1xf32> to vector<8x1xf32>
    %298 = arith.subf %297, %293 : vector<8x1xf32>
    %299 = math.exp %298 : vector<8x1xf32>
    %300 = vector.extract_strided_slice %278 {offsets = [16, 0], sizes = [8, 1], strides = [1, 1]} : vector<64x1xf32> to vector<8x1xf32>
    %301 = arith.subf %300, %293 : vector<8x1xf32>
    %302 = math.exp %301 : vector<8x1xf32>
    %303 = vector.extract_strided_slice %278 {offsets = [24, 0], sizes = [8, 1], strides = [1, 1]} : vector<64x1xf32> to vector<8x1xf32>
    %304 = arith.subf %303, %293 : vector<8x1xf32>
    %305 = math.exp %304 : vector<8x1xf32>
    %306 = vector.extract_strided_slice %278 {offsets = [32, 0], sizes = [8, 1], strides = [1, 1]} : vector<64x1xf32> to vector<8x1xf32>
    %307 = arith.subf %306, %293 : vector<8x1xf32>
    %308 = math.exp %307 : vector<8x1xf32>
    %309 = vector.extract_strided_slice %278 {offsets = [40, 0], sizes = [8, 1], strides = [1, 1]} : vector<64x1xf32> to vector<8x1xf32>
    %310 = arith.subf %309, %293 : vector<8x1xf32>
    %311 = math.exp %310 : vector<8x1xf32>
    %312 = vector.extract_strided_slice %278 {offsets = [48, 0], sizes = [8, 1], strides = [1, 1]} : vector<64x1xf32> to vector<8x1xf32>
    %313 = arith.subf %312, %293 : vector<8x1xf32>
    %314 = math.exp %313 : vector<8x1xf32>
    %315 = vector.extract_strided_slice %278 {offsets = [56, 0], sizes = [8, 1], strides = [1, 1]} : vector<64x1xf32> to vector<8x1xf32>
    %316 = arith.subf %315, %293 : vector<8x1xf32>
    %317 = math.exp %316 : vector<8x1xf32>
    %318 = arith.addf %296, %299 : vector<8x1xf32>
    %319 = arith.addf %318, %302 : vector<8x1xf32>
    %320 = arith.addf %319, %305 : vector<8x1xf32>
    %321 = arith.addf %320, %308 : vector<8x1xf32>
    %322 = arith.addf %321, %311 : vector<8x1xf32>
    %323 = arith.addf %322, %314 : vector<8x1xf32>
    %324 = arith.addf %323, %317 : vector<8x1xf32>
    %325 = tpu.reciprocal %324 {approx = true} : vector<8x1xf32> -> vector<8x1xf32>
    %326 = arith.mulf %296, %325 : vector<8x1xf32>
    %327 = vector.extract_strided_slice %257 {offsets = [0, 0], sizes = [8, 32], strides = [1, 1]} : vector<64x32xf32> to vector<8x32xf32>
    %328 = vector.broadcast %326 : vector<8x1xf32> to vector<8x32xf32>
    %329 = arith.mulf %328, %327 : vector<8x32xf32>
    %330 = arith.mulf %299, %325 : vector<8x1xf32>
    %331 = vector.extract_strided_slice %257 {offsets = [8, 0], sizes = [8, 32], strides = [1, 1]} : vector<64x32xf32> to vector<8x32xf32>
    %332 = vector.broadcast %330 : vector<8x1xf32> to vector<8x32xf32>
    %333 = arith.mulf %332, %331 : vector<8x32xf32>
    %334 = arith.addf %329, %333 : vector<8x32xf32>
    %335 = arith.mulf %302, %325 : vector<8x1xf32>
    %336 = vector.extract_strided_slice %257 {offsets = [16, 0], sizes = [8, 32], strides = [1, 1]} : vector<64x32xf32> to vector<8x32xf32>
    %337 = vector.broadcast %335 : vector<8x1xf32> to vector<8x32xf32>
    %338 = arith.mulf %337, %336 : vector<8x32xf32>
    %339 = arith.addf %334, %338 : vector<8x32xf32>
    %340 = arith.mulf %305, %325 : vector<8x1xf32>
    %341 = vector.extract_strided_slice %257 {offsets = [24, 0], sizes = [8, 32], strides = [1, 1]} : vector<64x32xf32> to vector<8x32xf32>
    %342 = vector.broadcast %340 : vector<8x1xf32> to vector<8x32xf32>
    %343 = arith.mulf %342, %341 : vector<8x32xf32>
    %344 = arith.addf %339, %343 : vector<8x32xf32>
    %345 = arith.mulf %308, %325 : vector<8x1xf32>
    %346 = vector.extract_strided_slice %257 {offsets = [32, 0], sizes = [8, 32], strides = [1, 1]} : vector<64x32xf32> to vector<8x32xf32>
    %347 = vector.broadcast %345 : vector<8x1xf32> to vector<8x32xf32>
    %348 = arith.mulf %347, %346 : vector<8x32xf32>
    %349 = arith.addf %344, %348 : vector<8x32xf32>
    %350 = arith.mulf %311, %325 : vector<8x1xf32>
    %351 = vector.extract_strided_slice %257 {offsets = [40, 0], sizes = [8, 32], strides = [1, 1]} : vector<64x32xf32> to vector<8x32xf32>
    %352 = vector.broadcast %350 : vector<8x1xf32> to vector<8x32xf32>
    %353 = arith.mulf %352, %351 : vector<8x32xf32>
    %354 = arith.addf %349, %353 : vector<8x32xf32>
    %355 = arith.mulf %314, %325 : vector<8x1xf32>
    %356 = vector.extract_strided_slice %257 {offsets = [48, 0], sizes = [8, 32], strides = [1, 1]} : vector<64x32xf32> to vector<8x32xf32>
    %357 = vector.broadcast %355 : vector<8x1xf32> to vector<8x32xf32>
    %358 = arith.mulf %357, %356 : vector<8x32xf32>
    %359 = arith.addf %354, %358 : vector<8x32xf32>
    %360 = arith.mulf %317, %325 : vector<8x1xf32>
    %361 = vector.extract_strided_slice %257 {offsets = [56, 0], sizes = [8, 32], strides = [1, 1]} : vector<64x32xf32> to vector<8x32xf32>
    %362 = vector.broadcast %360 : vector<8x1xf32> to vector<8x32xf32>
    %363 = arith.mulf %362, %361 : vector<8x32xf32>
    %364 = arith.addf %359, %363 : vector<8x32xf32>
    %c0_72 = arith.constant 0 : index
    %c0_73 = arith.constant 0 : index
    %365 = vector.load %arg1[%c0_72, %c0_73] : memref<8x32xf32, #tpu.memory_space<vmem>>, vector<8x32xf32>
    %c0_74 = arith.constant 0 : index
    %c0_75 = arith.constant 0 : index
    %366 = vector.load %arg21[%c0_74, %c0_75] : memref<8x96xf32, #tpu.memory_space<vmem>>, vector<8x32xf32>
    tpu.vector_store %arg21[%c0_74, %c0_75], %365 {strides = array<i32>} : memref<8x96xf32, #tpu.memory_space<vmem>>, vector<8x32xf32>,
    %c0_76 = arith.constant 0 : index
    %c0_77 = arith.constant 0 : index
    %367 = vector.load %arg2[%c0_76, %c0_77] : memref<8x32xf32, #tpu.memory_space<vmem>>, vector<8x32xf32>
    %c0_78 = arith.constant 0 : index
    %c32_79 = arith.constant 32 : index
    %368 = vector.load %arg21[%c0_78, %c32_79] : memref<8x96xf32, #tpu.memory_space<vmem>>, vector<8x32xf32>
    tpu.vector_store %arg21[%c0_78, %c32_79], %367 {strides = array<i32>} : memref<8x96xf32, #tpu.memory_space<vmem>>, vector<8x32xf32>,
    %c0_80 = arith.constant 0 : index
    %c64 = arith.constant 64 : index
    %369 = vector.load %arg21[%c0_80, %c64] : memref<8x96xf32, #tpu.memory_space<vmem>>, vector<8x32xf32>
    tpu.vector_store %arg21[%c0_80, %c64], %364 {strides = array<i32>} : memref<8x96xf32, #tpu.memory_space<vmem>>, vector<8x32xf32>,
    %c0_81 = arith.constant 0 : index
    %c0_82 = arith.constant 0 : index
    %370 = vector.load %arg21[%c0_81, %c0_82] : memref<8x96xf32, #tpu.memory_space<vmem>>, vector<8x96xf32>
    %c0_83 = arith.constant 0 : index
    %c0_84 = arith.constant 0 : index
    %371 = vector.load %arg13[%c0_83, %c0_84] : memref<96x128xf32, #tpu.memory_space<vmem>>, vector<96x128xf32>
    %cst_85 = arith.constant dense<0.000000e+00> : vector<8x128xf32>
    %372 = tpu.matmul %370, %371, %cst_85 {dimension_numbers = #tpu.dot_dimension_numbers<[1], [0], [0], [1], [0, 0, 1, 1], [], []>} : vector<8x96xf32>, vector<96x128xf32>, vector<8x128xf32> -> vector<8x128xf32>
    %c0_86 = arith.constant 0 : index
    %c0_87 = arith.constant 0 : index
    %373 = vector.load %arg14[%c0_86, %c0_87] : memref<1x128xf32, #tpu.memory_space<vmem>>, vector<1x128xf32>
    %374 = vector.broadcast %373 : vector<1x128xf32> to vector<8x128xf32>
    %375 = arith.addf %372, %374 : vector<8x128xf32>
    %cst_88 = arith.constant 0.000000e+00 : f32
    %376 = vector.broadcast %cst_88 : f32 to vector<8x128xf32>
    %377 = arith.maximumf %375, %376 : vector<8x128xf32>
    %c0_89 = arith.constant 0 : index
    %c0_90 = arith.constant 0 : index
    %378 = vector.load %arg15[%c0_89, %c0_90] : memref<128x128xf32, #tpu.memory_space<vmem>>, vector<128x128xf32>
    %cst_91 = arith.constant dense<0.000000e+00> : vector<8x128xf32>
    %379 = tpu.matmul %377, %378, %cst_91 {dimension_numbers = #tpu.dot_dimension_numbers<[1], [0], [0], [1], [0, 0, 1, 1], [], []>} : vector<8x128xf32>, vector<128x128xf32>, vector<8x128xf32> -> vector<8x128xf32>
    %c0_92 = arith.constant 0 : index
    %c0_93 = arith.constant 0 : index
    %380 = vector.load %arg16[%c0_92, %c0_93] : memref<1x128xf32, #tpu.memory_space<vmem>>, vector<1x128xf32>
    %381 = vector.broadcast %380 : vector<1x128xf32> to vector<8x128xf32>
    %382 = arith.addf %379, %381 : vector<8x128xf32>
    %cst_94 = arith.constant 0.000000e+00 : f32
    %383 = vector.broadcast %cst_94 : f32 to vector<8x128xf32>
    %384 = arith.maximumf %382, %383 : vector<8x128xf32>
    %c0_95 = arith.constant 0 : index
    %c0_96 = arith.constant 0 : index
    %385 = vector.load %arg17[%c0_95, %c0_96] : memref<128x1xf32, #tpu.memory_space<vmem>>, vector<128x1xf32>
    %cst_97 = arith.constant dense<0.000000e+00> : vector<8x1xf32>
    %386 = tpu.matmul %384, %385, %cst_97 {dimension_numbers = #tpu.dot_dimension_numbers<[1], [0], [0], [1], [0, 0, 1, 1], [], []>} : vector<8x128xf32>, vector<128x1xf32>, vector<8x1xf32> -> vector<8x1xf32>
    %c0_98 = arith.constant 0 : index
    %c0_99 = arith.constant 0 : index
    %387 = vector.load %arg18[%c0_98, %c0_99] : memref<1x1xf32, #tpu.memory_space<vmem>>, vector<1x1xf32>
    %388 = vector.broadcast %387 : vector<1x1xf32> to vector<8x1xf32>
    %389 = arith.addf %386, %388 : vector<8x1xf32>
    %390 = arith.negf %389 : vector<8x1xf32>
    %391 = math.exp %390 : vector<8x1xf32>
    %cst_100 = arith.constant 1.000000e+00 : f32
    %392 = vector.broadcast %cst_100 : f32 to vector<8x1xf32>
    %393 = arith.addf %392, %391 : vector<8x1xf32>
    %394 = arith.divf %392, %393 : vector<8x1xf32>
    %c0_101 = arith.constant 0 : index
    %c0_102 = arith.constant 0 : index
    %395 = vector.load %arg19[%c0_101, %c0_102] : memref<8x1xf32, #tpu.memory_space<vmem>>, vector<8x1xf32>
    tpu.vector_store %arg19[%c0_101, %c0_102], %394 {strides = array<i32>} : memref<8x1xf32, #tpu.memory_space<vmem>>, vector<8x1xf32>,
    return
  }
}

</mosaic_0001>

<bundles_post_ra>
// kernel: tpu_custom_call.1
= control target key start
LH: loop header
LB: loop body
LE: loop exit
PB: predicated region body
PF: predicated region fallthrough
CT: control target
= control target key end

     0   :  { %v2578_v0 = vmov 0.0|0.0   ;;  %vm2579_vm0 = vmmov 0   ;;  %v2580_v4 = vmov 0.0   ;;  %vm88_vm1 = vcmask 261120   ;;  %s2581_s26 = smov 64   ;;  %s2582_s29 = smov 96   ;;  %s3242_s4 = inlined_call_operand.vmem [shape: f32[32,128], index: 4, kind: input, shape index: {}]   ;;  %s3243_s5 = inlined_call_operand.vmem [shape: f32[32,128], index: 5, kind: input, shape index: {}]   ;;  %s3244_s0 = inlined_call_operand.vmem [shape: f32[64,32], index: 0, kind: input, shape index: {}]   ;;  %s3245_s7 = inlined_call_operand.vmem [shape: f32[1,128], index: 7, kind: input, shape index: {}]   ;;  %s3246_s6 = inlined_call_operand.vmem [shape: f32[1,128], index: 6, kind: input, shape index: {}]   ;;  %s3247_s10 = inlined_call_operand.vmem [shape: f32[32,128], index: 10, kind: input, shape index: {}]   ;;  %s3248_s8 = inlined_call_operand.vmem [shape: f32[32,128], index: 8, kind: input, shape index: {}]   ;;  %s3249_s2 = inlined_call_operand.vmem [shape: f32[8,32], index: 2, kind: input, shape index: {}]   ;;  %s3250_s12 = inlined_call_operand.vmem [shape: f32[128,1], index: 12, kind: input, shape index: {}]   ;;  %s3251_s9 = inlined_call_operand.vmem [shape: f32[1,128], index: 9, kind: input, shape index: {}]   ;;  %s3252_s11 = inlined_call_operand.vmem [shape: f32[1,128], index: 11, kind: input, shape index: {}]   ;;  %s3253_s3 = inlined_call_operand.vmem [shape: f32[64,1], index: 3, kind: input, shape index: {}]   ;;  %s3254_s13 = inlined_call_operand.vmem [shape: f32[96,128], index: 13, kind: input, shape index: {}]   ;;  %s3255_s1 = inlined_call_operand.vmem [shape: f32[8,32], index: 1, kind: input, shape index: {}]   ;;  %s3256_s15 = inlined_call_operand.vmem [shape: f32[128,128], index: 15, kind: input, shape index: {}]   ;;  %s3257_s17 = inlined_call_operand.vmem [shape: f32[128,1], index: 17, kind: input, shape index: {}]   ;;  %s3258_s14 = inlined_call_operand.vmem [shape: f32[1,128], index: 14, kind: input, shape index: {}]   ;;  %s3259_s18 = inlined_call_operand.<no memory space> [shape: f32[1,1], index: 18, kind: input, shape index: {}]   ;;  %s3260_s16 = inlined_call_operand.vmem [shape: f32[1,128], index: 16, kind: input, shape index: {}]   ;;  %s3261_s19 = inlined_call_operand.vmem [shape: f32[8,1], index: 19, kind: output, shape index: {}]  }
   0x1   :  { %3265 = sst [smem:[#allocation5_spill]] %s3242_s4  ;;  %2323 = vmatprep.subr.bf16.mxu1 %v2578_v0  ;;  %2063 = vmatprep.mubr.msk.f32.mxu1 %vm2579_vm0, %v2580_v4  ;;  %v2750_v22 = vld [vmem:[%s3246_s6] ss:$0 sm:$0xff]  ;;  %vm1552_vm10 = vcmask 523520   ;;  %vm1558_vm11 = vcmask 785920   ;;  %vm1580_vm12 = vcmask 785408  }
   0x2   :  { %3266 = sst [smem:[#allocation6_spill]] %s3243_s5  ;;  %s3269_s20 = sld [smem:[#allocation5_spill]]  ;;  %vm1848_vm13 = vcmask 7168  }
   0x3   :  { %3267 = sst [smem:[#allocation7_spill]] %s3244_s0  ;;  %s3270_s23 = sld [smem:[#allocation6_spill]] }
   0x4   :  { %3268 = sst [smem:[#allocation8_spill]] %s3245_s7  ;;  %s3271_s0 = sld [smem:[#allocation7_spill]] }
   0x5   :  { %s3272_s7 = sld [smem:[#allocation8_spill]] }
   0x8   :  { %v77_v1 = vld [vmem:[%s3269_s20] sm:$0xff]  ;;  %v78_v2 = vld [vmem:[%s3269_s20 + $0x8] sm:$0xff]  ;;  %v79_v7 = vld [vmem:[%s3269_s20 + $0x10] sm:$0xff] }
   0x9   :  { %v64_v3 = vld [vmem:[%s3270_s23] sm:$0xff]  ;;  %v2315_v5 = vpack.c.bf16 %v78_v2, %v77_v1  ;;  %v65_v6 = vld [vmem:[%s3270_s23 + $0x8] sm:$0xff]  ;;  %v80_v8 = vld [vmem:[%s3269_s20 + $0x18] sm:$0xff] }
   0xa   :  { %v2706_v9 = vpack.c.bf16 %v65_v6, %v64_v3  ;;  %v2319_v10 = vpack.c.bf16 %v80_v8, %v79_v7  ;;  %v66_v11 = vld [vmem:[%s3270_s23 + $0x10] sm:$0xff]  ;;  %v67_v12 = vld [vmem:[%s3270_s23 + $0x18] sm:$0xff]  ;;  %v69_v13 = vld [vmem:[%s3271_s0] sm:$0xff] }
   0xb   :  { %2316 = vmatprep.subr.bf16.mxu0 %v2315_v5  ;;  %2043 = vmatprep.mubr.msk.f32.mxu0 %vm88_vm1, %v69_v13  ;;  %v2719_v14 = vpack.c.bf16 %v67_v12, %v66_v11  ;;  %v70_v15 = vld [vmem:[%s3271_s0 + $0x8] sm:$0xff]  ;;  %v2743_v16 = vld [vmem:[%s3272_s7] ss:$0 sm:$0xff]  ;;  %v71_v53 = vld [vmem:[%s3271_s0 + $0x10] sm:$0xff] }
   0xc   :  { %2325 = vmatpush3.bf16.msra.mxu1 %v2706_v9  ;;  %2318 = vmatpush3.bf16.msra.mxu0 %v2315_v5  ;;  %v72_v54 = vld [vmem:[%s3271_s0 + $0x18] sm:$0xff]  ;;  %v73_v55 = vld [vmem:[%s3271_s0 + $0x20] sm:$0xff]  ;;  %v74_v56 = vld [vmem:[%s3271_s0 + $0x28] sm:$0xff] }
   0xd   :  { %2326 = vmatprep.subr.bf16.mxu1 %v2578_v0  ;;  %2320 = vmatprep.subr.bf16.mxu0 %v2319_v10  ;;  %v75_v57 = vld [vmem:[%s3271_s0 + $0x30] sm:$0xff]  ;;  %v76_v58 = vld [vmem:[%s3271_s0 + $0x38] sm:$0xff] }
  0x10   :  { %2328 = vmatpush3.bf16.msra.mxu1 %v2719_v14  ;;  %2322 = vmatpush3.bf16.msra.mxu0 %v2319_v10 }
  0x11   :  { %2329 = vmatprep.subr.bf16.mxu1 %v2578_v0  ;;  %2335 = vmatprep.subr.bf16.mxu0 %v2578_v0 }
  0x13   :  { %2064 = vmatmul.mubr.f32.vlgmr.msra.gmra.mrb[0].mxu1 %v2580_v4  ;;  %2044 = vmatmul.mubr.msk.f32.vlgmr.msra.gmra.mrb[0].mxu0 %vm88_vm1, %v70_v15 }
  0x14   :  { %2331 = vmatpush3.bf16.msra.mxu1 %v2706_v9  ;;  %2074 = vmatprep.mubr.msk.f32.mxu1 %vm2579_vm0, %v2580_v4 }
  0x15   :  { %2332 = vmatprep.subr.bf16.mxu1 %v2578_v0  ;;  %2337 = vmatpush3.bf16.msra.mxu0 %v2706_v9 }
  0x16   :  { %2338 = vmatprep.subr.bf16.mxu0 %v2578_v0  ;;  %2046 = vmatprep.mubr.msk.f32.mxu0 %vm88_vm1, %v71_v53 }
  0x17   :  { %2047 = vmatmul.mubr.msk.f32.gmra.mrb[2].mxu0 %vm88_vm1, %v72_v54 }
  0x18   :  { %2334 = vmatpush3.bf16.msra.mxu1 %v2719_v14  ;;  %2049 = vmatprep.mubr.msk.f32.mxu0 %vm88_vm1, %v73_v55 }
  0x19   :  { %2340 = vmatpush3.bf16.msra.mxu0 %v2719_v14  ;;  %2341 = vmatprep.subr.bf16.mxu1 %v2578_v0 }
  0x1a   :  { %2347 = vmatprep.subr.bf16.mxu0 %v2578_v0 }
  0x1b   :  { %2050 = vmatmul.mubr.msk.f32.gmra.mrb[4].mxu0 %vm88_vm1, %v74_v56 }
  0x1c   :  { %2052 = vmatprep.mubr.msk.f32.mxu0 %vm88_vm1, %v75_v57 }
  0x1f   :  { %2053 = vmatmul.mubr.msk.f32.gmra.mrb[6].mxu0 %vm88_vm1, %v76_v58 }
  0x20   :  { %2085 = vmatprep.mubr.msk.f32.mxu0 %vm2579_vm0, %v2580_v4 }
  0xe6   :  { %v293_v17 = vpop.f32.mrb[0].mxu1  ;;  %v2045_v18 = vpop.f32.mrb[0].mxu0 }
  0xe7   :  { %v294_v19 = vadd.f32 %v2743_v16, %v293_v17  ;;  %v2065_v20 = vpop.f32.mrb[1].mxu1  ;;  %v179_v21 = vpop.f32.mrb[1].mxu0  ;;  %v185_v43 = vadd.f32 %v2045_v18, %v2750_v22 }
  0xe8   :  { %v180_v23 = vadd.f32 %v2750_v22, %v179_v21 }
  0xe9   :  { %305 = vrot.lane.b32.xlu0 %v294_v19, %s2581_s26 }
  0xea   :  { %v297_v24 = vadd.f32 %v294_v19, %v180_v23  ;;  %v2048_v2 = vpop.f32.mrb[2].mxu0 }
  0xeb   :  { %v189_v3 = vpop.f32.mrb[3].mxu0 }
  0xec   :  { %v1864_v25 = vmul.f32 -1.442695, %v297_v24  ;;  %v190_v15 = vadd.f32 %v2750_v22, %v189_v3 }
  0xee   :  { %2492 = vpow2.f32 %v1864_v25  ;;  %v2796_v5 = vpop.f32.mrb[4].mxu0 }
  0xef   :  { %v2798_v6 = vpop.f32.mrb[5].mxu0 }
  0xf0   :  { %v200_v57 = vadd.f32 %v2750_v22, %v2798_v6 }
  0xf2   :  { %v2800_v7 = vpop.f32.mrb[6].mxu0 }
  0xf3   :  { %v2802_v8 = vpop.f32.mrb[7].mxu0 }
  0xf8   :  { %v2493_v26 = vpop.eup %2492 }
  0xf9   :  { %v301_v27 = vadd.f32 1.0, %v2493_v26 }
  0xfb   :  { %2494 = vrcp.f32 %v301_v27 }
 0x105   :  { %v2495_v28 = vpop.eup %2494 }
 0x106   :  { %v315_v34 = vsub.f32 1.0, %v2495_v28  ;;  %v321_v36 = vmul.f32 0.0, %v2495_v28 }
 0x15b   :  { %v306_v29 = vpop.permute.xlu0 %305 }
 0x15c   :  { %v308_v30 = vmul.f32 %v2495_v28, %v306_v29 }
 0x15e   :  { %310 = vrot.lane.b32.xlu0 %v308_v30, %s2581_s26 }
 0x1d0   :  { %v311_v31 = vpop.permute.xlu0 %310 }
 0x1d1   :  { %v313_v32 = vadd.f32 %v311_v31, %v180_v23 }
 0x1d3   :  { %2496 = vtanh.f32 %v313_v32 }
 0x1dd   :  { %v2497_v33 = vpop.eup %2496 }
 0x1de   :  { %317 = vrot.lane.b32.xlu1 %v2497_v33, %s2582_s29 }
 0x250   :  { %v318_v35 = vpop.permute.xlu1 %317 }
 0x251   :  { %v320_v37 = vmul.f32 %v318_v35, %v315_v34 }
 0x253   :  { %v322_v38 = vadd.f32 %v321_v36, %v320_v37  ;;  %v195_v37 = vadd.f32 %v2048_v2, %v2750_v22 }
 0x255   :  { %324 = vrot.lane.b32.xlu1 %v322_v38, %s2582_s29 }
 0x2c7   :  { %v325_v39 = vpop.permute.xlu1 %324 }
 0x2c8   :  { %327 = vst.msk [vmem:[#allocation2] sm:$0xff] %vm88_vm1, %v325_v39  ;;  %2075 = vmatmul.mubr.msk.f32.vlgmr.msra.gmra.mrb[2].mxu1 %vm88_vm1, %v325_v39 }
 0x2c9   :  { %2343 = vmatpush3.bf16.msra.mxu1 %v2706_v9  ;;  %2096 = vmatprep.mubr.msk.f32.mxu1 %vm2579_vm0, %v2580_v4 }
 0x2ca   :  { %2344 = vmatprep.subr.bf16.mxu1 %v2578_v0 }
 0x2cd   :  { %2346 = vmatpush3.bf16.msra.mxu1 %v2719_v14 }
 0x2ce   :  { %2353 = vmatprep.subr.bf16.mxu1 %v2578_v0 }
 0x39b   :  { %v396_v40 = vpop.f32.mrb[2].mxu1 }
 0x39c   :  { %v397_v41 = vadd.f32 %v2743_v16, %v396_v40  ;;  %v2076_v42 = vpop.f32.mrb[3].mxu1 }
 0x39e   :  { %408 = vrot.lane.b32.xlu0 %v397_v41, %s2581_s26  ;;  %v400_v44 = vadd.f32 %v397_v41, %v185_v43 }
 0x3a0   :  { %v1866_v45 = vmul.f32 -1.442695, %v400_v44 }
 0x3a2   :  { %2498 = vpow2.f32 %v1866_v45 }
 0x3ac   :  { %v2499_v46 = vpop.eup %2498 }
 0x3ad   :  { %v404_v47 = vadd.f32 1.0, %v2499_v46 }
 0x3af   :  { %2500 = vrcp.f32 %v404_v47 }
 0x3b9   :  { %v2501_v48 = vpop.eup %2500 }
 0x3ba   :  { %v418_v60 = vsub.f32 1.0, %v2501_v48  ;;  %v424_v62 = vmul.f32 %v2501_v48, %v322_v38 }
 0x410   :  { %v409_v49 = vpop.permute.xlu0 %408 }
 0x411   :  { %v411_v50 = vmul.f32 %v2501_v48, %v409_v49 }
 0x413   :  { %413 = vrot.lane.b32.xlu1 %v411_v50, %s2581_s26 }
 0x485   :  { %v414_v51 = vpop.permute.xlu1 %413 }
 0x486   :  { %v416_v52 = vadd.f32 %v414_v51, %v185_v43 }
 0x488   :  { %2502 = vtanh.f32 %v416_v52 }
 0x492   :  { %v2503_v59 = vpop.eup %2502 }
 0x493   :  { %420 = vrot.lane.b32.xlu0 %v2503_v59, %s2582_s29 }
 0x505   :  { %v421_v61 = vpop.permute.xlu0 %420 }
 0x506   :  { %v423_v63 = vmul.f32 %v421_v61, %v418_v60 }
 0x508   :  { %v425_v1 = vadd.f32 %v424_v62, %v423_v63 }
 0x50a   :  { %427 = vrot.lane.b32.xlu1 %v425_v1, %s2582_s29 }
 0x57c   :  { %v428_v10 = vpop.permute.xlu1 %427 }
 0x57d   :  { %430 = vst.msk [vmem:[#allocation2 + $0x8] sm:$0xff] %vm88_vm1, %v428_v10  ;;  %2086 = vmatmul.mubr.msk.f32.vlgmr.msra.gmra.mrb[8].mxu0 %vm88_vm1, %v428_v10 }
 0x57e   :  { %2349 = vmatpush3.bf16.msra.mxu0 %v2706_v9  ;;  %2107 = vmatprep.mubr.msk.f32.mxu0 %vm2579_vm0, %v2580_v4 }
 0x57f   :  { %2350 = vmatprep.subr.bf16.mxu0 %v2578_v0 }
 0x582   :  { %2352 = vmatpush3.bf16.msra.mxu0 %v2719_v14 }
 0x583   :  { %2359 = vmatprep.subr.bf16.mxu0 %v2578_v0 }
 0x650   :  { %v499_v11 = vpop.f32.mrb[8].mxu0 }
 0x651   :  { %v500_v12 = vadd.f32 %v2743_v16, %v499_v11  ;;  %v2087_v13 = vpop.f32.mrb[9].mxu0 }
 0x653   :  { %511 = vrot.lane.b32.xlu0 %v500_v12, %s2581_s26  ;;  %v503_v17 = vadd.f32 %v500_v12, %v190_v15 }
 0x655   :  { %v1868_v18 = vmul.f32 -1.442695, %v503_v17 }
 0x657   :  { %2504 = vpow2.f32 %v1868_v18 }
 0x661   :  { %v2505_v19 = vpop.eup %2504 }
 0x662   :  { %v507_v20 = vadd.f32 1.0, %v2505_v19 }
 0x664   :  { %2506 = vrcp.f32 %v507_v20 }
 0x66e   :  { %v2507_v21 = vpop.eup %2506 }
 0x66f   :  { %v521_v28 = vsub.f32 1.0, %v2507_v21  ;;  %v527_v30 = vmul.f32 %v2507_v21, %v425_v1 }
 0x6c5   :  { %v512_v23 = vpop.permute.xlu0 %511 }
 0x6c6   :  { %v514_v24 = vmul.f32 %v2507_v21, %v512_v23  ;;  %v205_v21 = vadd.f32 %v2796_v5, %v2750_v22 }
 0x6c8   :  { %516 = vrot.lane.b32.xlu1 %v514_v24, %s2581_s26 }
 0x73a   :  { %v517_v25 = vpop.permute.xlu1 %516 }
 0x73b   :  { %v519_v26 = vadd.f32 %v517_v25, %v190_v15 }
 0x73d   :  { %2508 = vtanh.f32 %v519_v26 }
 0x747   :  { %v2509_v27 = vpop.eup %2508 }
 0x748   :  { %523 = vrot.lane.b32.xlu0 %v2509_v27, %s2582_s29 }
 0x7ba   :  { %v524_v29 = vpop.permute.xlu0 %523 }
 0x7bb   :  { %v526_v31 = vmul.f32 %v524_v29, %v521_v28 }
 0x7bd   :  { %v528_v32 = vadd.f32 %v527_v30, %v526_v31 }
 0x7bf   :  { %530 = vrot.lane.b32.xlu1 %v528_v32, %s2582_s29 }
 0x831   :  { %v531_v33 = vpop.permute.xlu1 %530 }
 0x832   :  { %533 = vst.msk [vmem:[#allocation2 + $0x10] sm:$0xff] %vm88_vm1, %v531_v33  ;;  %2097 = vmatmul.mubr.msk.f32.vlgmr.msra.gmra.mrb[4].mxu1 %vm88_vm1, %v531_v33 }
 0x833   :  { %2355 = vmatpush3.bf16.msra.mxu1 %v2706_v9  ;;  %2118 = vmatprep.mubr.msk.f32.mxu1 %vm2579_vm0, %v2580_v4 }
 0x834   :  { %2356 = vmatprep.subr.bf16.mxu1 %v2578_v0 }
 0x837   :  { %2358 = vmatpush3.bf16.msra.mxu1 %v2719_v14 }
 0x838   :  { %2365 = vmatprep.subr.bf16.mxu1 %v2578_v0 }
 0x905   :  { %v602_v34 = vpop.f32.mrb[4].mxu1 }
 0x906   :  { %v603_v35 = vadd.f32 %v2743_v16, %v602_v34  ;;  %v2098_v36 = vpop.f32.mrb[5].mxu1 }
 0x908   :  { %614 = vrot.lane.b32.xlu0 %v603_v35, %s2581_s26  ;;  %v606_v38 = vadd.f32 %v603_v35, %v195_v37 }
 0x90a   :  { %v1870_v39 = vmul.f32 -1.442695, %v606_v38 }
 0x90c   :  { %2510 = vpow2.f32 %v1870_v39  ;;  %v210_v39 = vadd.f32 %v2750_v22, %v2802_v8  ;;  %v1143_v8 = vld [vmem:[%s3247_s10 + $0x8] sm:$0xff] }
 0x916   :  { %v2511_v40 = vpop.eup %2510 }
 0x917   :  { %v610_v41 = vadd.f32 1.0, %v2511_v40 }
 0x919   :  { %2512 = vrcp.f32 %v610_v41 }
 0x923   :  { %v2513_v42 = vpop.eup %2512 }
 0x924   :  { %v624_v48 = vsub.f32 1.0, %v2513_v42  ;;  %v630_v50 = vmul.f32 %v2513_v42, %v528_v32 }
 0x97a   :  { %v615_v43 = vpop.permute.xlu0 %614 }
 0x97b   :  { %v617_v44 = vmul.f32 %v2513_v42, %v615_v43 }
 0x97d   :  { %619 = vrot.lane.b32.xlu1 %v617_v44, %s2581_s26 }
 0x9ef   :  { %v620_v45 = vpop.permute.xlu1 %619 }
 0x9f0   :  { %v622_v46 = vadd.f32 %v620_v45, %v195_v37 }
 0x9f2   :  { %2514 = vtanh.f32 %v622_v46 }
 0x9fc   :  { %v2515_v47 = vpop.eup %2514 }
 0x9fd   :  { %626 = vrot.lane.b32.xlu0 %v2515_v47, %s2582_s29 }
 0xa6f   :  { %v627_v49 = vpop.permute.xlu0 %626 }
 0xa70   :  { %v629_v51 = vmul.f32 %v627_v49, %v624_v48  ;;  %v1142_v49 = vld [vmem:[%s3247_s10] sm:$0xff] }
 0xa72   :  { %v631_v52 = vadd.f32 %v630_v50, %v629_v51  ;;  %v2377_v50 = vpack.c.bf16 %v1143_v8, %v1142_v49 }
 0xa74   :  { %633 = vrot.lane.b32.xlu1 %v631_v52, %s2582_s29 }
 0xae6   :  { %v634_v53 = vpop.permute.xlu1 %633 }
 0xae7   :  { %636 = vst.msk [vmem:[#allocation2 + $0x18] sm:$0xff] %vm88_vm1, %v634_v53  ;;  %2108 = vmatmul.mubr.msk.f32.vlgmr.msra.gmra.mrb[10].mxu0 %vm88_vm1, %v634_v53  ;;  %v1059_v53 = vld [vmem:[%s3248_s8 + $0x8] sm:$0xff] }
 0xae8   :  { %2361 = vmatpush3.bf16.msra.mxu0 %v2706_v9  ;;  %2129 = vmatprep.mubr.msk.f32.mxu0 %vm2579_vm0, %v2580_v4 }
 0xae9   :  { %2362 = vmatprep.subr.bf16.mxu0 %v2578_v0 }
 0xaec   :  { %2364 = vmatpush3.bf16.msra.mxu0 %v2719_v14 }
 0xaed   :  { %2371 = vmatprep.subr.bf16.mxu0 %v2578_v0 }
 0xbba   :  { %v705_v54 = vpop.f32.mrb[10].mxu0 }
 0xbbb   :  { %v706_v55 = vadd.f32 %v2743_v16, %v705_v54  ;;  %v2109_v56 = vpop.f32.mrb[11].mxu0 }
 0xbbc   :  { %v1061_v56 = vld [vmem:[%s3248_s8 + $0x18] sm:$0xff] }
 0xbbd   :  { %717 = vrot.lane.b32.xlu0 %v706_v55, %s2581_s26  ;;  %v709_v58 = vadd.f32 %v706_v55, %v200_v57  ;;  %v1060_v55 = vld [vmem:[%s3248_s8 + $0x10] sm:$0xff] }
 0xbbf   :  { %v1872_v59 = vmul.f32 -1.442695, %v709_v58  ;;  %v2893_v58 = vld [vmem:[%s3249_s2] sm:$0xff] }
 0xbc1   :  { %2516 = vpow2.f32 %v1872_v59 }
 0xbcb   :  { %v2517_v60 = vpop.eup %2516 }
 0xbcc   :  { %v713_v61 = vadd.f32 1.0, %v2517_v60 }
 0xbce   :  { %2518 = vrcp.f32 %v713_v61 }
 0xbd8   :  { %v2519_v62 = vpop.eup %2518 }
 0xbd9   :  { %v727_v11 = vsub.f32 1.0, %v2519_v62  ;;  %v733_v6 = vmul.f32 %v2519_v62, %v631_v52  ;;  %v1058_v52 = vld [vmem:[%s3248_s8] sm:$0xff] }
 0xbda   :  { %v2372_v54 = vpack.c.bf16 %v1059_v53, %v1058_v52 }
 0xc2f   :  { %v718_v63 = vpop.permute.xlu0 %717 }
 0xc30   :  { %v720_v1 = vmul.f32 %v2519_v62, %v718_v63 }
 0xc32   :  { %722 = vrot.lane.b32.xlu1 %v720_v1, %s2581_s26  ;;  %v1298_v1 = vld [vmem:[%s3250_s12] sm:$0xff] }
 0xca4   :  { %v723_v2 = vpop.permute.xlu1 %722 }
 0xca5   :  { %v725_v3 = vadd.f32 %v723_v2, %v200_v57  ;;  %v2375_v57 = vpack.c.bf16 %v1061_v56, %v1060_v55  ;;  %v1299_v2 = vld [vmem:[%s3250_s12 + $0x8] sm:$0xff] }
 0xca7   :  { %2520 = vtanh.f32 %v725_v3  ;;  %v1300_v3 = vld [vmem:[%s3250_s12 + $0x10] sm:$0xff] }
 0xcb1   :  { %v2521_v10 = vpop.eup %2520 }
 0xcb2   :  { %729 = vrot.lane.b32.xlu0 %v2521_v10, %s2582_s29  ;;  %v2385_v10 = vpack.c.bf16 %v1299_v2, %v1298_v1 }
 0xd24   :  { %v730_v12 = vpop.permute.xlu0 %729 }
 0xd25   :  { %v732_v13 = vmul.f32 %v730_v12, %v727_v11  ;;  %v1301_v11 = vld [vmem:[%s3250_s12 + $0x18] sm:$0xff] }
 0xd26   :  { %v2389_v12 = vpack.c.bf16 %v1301_v11, %v1300_v3 }
 0xd27   :  { %v734_v15 = vadd.f32 %v733_v6, %v732_v13  ;;  %v1144_v6 = vld [vmem:[%s3247_s10 + $0x10] sm:$0xff]  ;;  %v1145_v13 = vld [vmem:[%s3247_s10 + $0x18] sm:$0xff] }
 0xd29   :  { %736 = vrot.lane.b32.xlu1 %v734_v15, %s2582_s29 }
 0xd9b   :  { %v737_v17 = vpop.permute.xlu1 %736 }
 0xd9c   :  { %739 = vst.msk [vmem:[#allocation2 + $0x20] sm:$0xff] %vm88_vm1, %v737_v17  ;;  %2119 = vmatmul.mubr.msk.f32.vlgmr.msra.gmra.mrb[6].mxu1 %vm88_vm1, %v737_v17 }
 0xd9d   :  { %2367 = vmatpush3.bf16.msra.mxu1 %v2706_v9  ;;  %2140 = vmatprep.mubr.msk.f32.mxu1 %vm2579_vm0, %v2580_v4 }
 0xd9e   :  { %2368 = vmatprep.subr.bf16.mxu1 %v2578_v0 }
 0xda1   :  { %2370 = vmatpush3.bf16.msra.mxu1 %v2719_v14 }
 0xda2   :  { %2378 = vmatprep.subr.bf16.mxu1 %v2377_v50 }
 0xe6f   :  { %v808_v18 = vpop.f32.mrb[6].mxu1 }
 0xe70   :  { %v809_v19 = vadd.f32 %v2743_v16, %v808_v18  ;;  %v2120_v20 = vpop.f32.mrb[7].mxu1  ;;  %v2921_v18 = vld [vmem:[#allocation2] sm:$0xff] }
 0xe71   :  { %v2930_v20 = vld [vmem:[#allocation2 + $0x10] sm:$0xff] }
 0xe72   :  { %820 = vrot.lane.b32.xlu0 %v809_v19, %s2581_s26  ;;  %v812_v23 = vadd.f32 %v809_v19, %v205_v21  ;;  %v2926_v19 = vld [vmem:[#allocation2 + $0x8] sm:$0xff] }
 0xe74   :  { %v1874_v24 = vmul.f32 -1.442695, %v812_v23  ;;  %v2938_v23 = vld [vmem:[#allocation2 + $0x20] sm:$0xff] }
 0xe76   :  { %2522 = vpow2.f32 %v1874_v24 }
 0xe80   :  { %v2523_v9 = vpop.eup %2522 }
 0xe81   :  { %v816_v25 = vadd.f32 1.0, %v2523_v9 }
 0xe83   :  { %2524 = vrcp.f32 %v816_v25  ;;  %v1302_v25 = vld [vmem:[%s3250_s12 + $0x20] sm:$0xff] }
 0xe8d   :  { %v2525_v26 = vpop.eup %2524 }
 0xe8e   :  { %v830_v31 = vsub.f32 1.0, %v2525_v26  ;;  %v836_v5 = vmul.f32 %v2525_v26, %v734_v15  ;;  %v2381_v15 = vpack.c.bf16 %v1145_v13, %v1144_v6 }
 0xee4   :  { %v821_v27 = vpop.permute.xlu0 %820 }
 0xee5   :  { %v823_v28 = vmul.f32 %v2525_v26, %v821_v27  ;;  %v1303_v26 = vld [vmem:[%s3250_s12 + $0x28] sm:$0xff] }
 0xee6   :  { %v2393_v27 = vpack.c.bf16 %v1303_v26, %v1302_v25 }
 0xee7   :  { %825 = vrot.lane.b32.xlu1 %v823_v28, %s2581_s26  ;;  %v1304_v28 = vld [vmem:[%s3250_s12 + $0x30] sm:$0xff] }
 0xf59   :  { %v826_v14 = vpop.permute.xlu1 %825 }
 0xf5a   :  { %v828_v29 = vadd.f32 %v826_v14, %v205_v21  ;;  %v2934_v21 = vld [vmem:[#allocation2 + $0x18] sm:$0xff] }
 0xf5b   :  { %v1305_v14 = vld [vmem:[%s3250_s12 + $0x38] sm:$0xff] }
 0xf5c   :  { %2526 = vtanh.f32 %v828_v29  ;;  %v2397_v29 = vpack.c.bf16 %v1305_v14, %v1304_v28 }
 0xf66   :  { %v2527_v30 = vpop.eup %2526 }
 0xf67   :  { %832 = vrot.lane.b32.xlu0 %v2527_v30, %s2582_s29  ;;  %v1306_v30 = vld [vmem:[%s3250_s12 + $0x40] sm:$0xff] }
 0xfd9   :  { %v833_v32 = vpop.permute.xlu0 %832 }
 0xfda   :  { %v835_v33 = vmul.f32 %v833_v32, %v830_v31  ;;  %v1307_v31 = vld [vmem:[%s3250_s12 + $0x48] sm:$0xff] }
 0xfdc   :  { %v837_v34 = vadd.f32 %v836_v5, %v835_v33  ;;  %v2401_v5 = vpack.c.bf16 %v1307_v31, %v1306_v30  ;;  %v1420_v31 = vld [vmem:[%s3253_s3 + $0x8] sm:$0xff] }
 0xfdd   :  { %vm1428_vm2 = vcmp.gt.f32.partialorder %v1420_v31, 0.0 }
 0xfde   :  { %839 = vrot.lane.b32.xlu1 %v837_v34, %s2582_s29 }
0x1050   :  { %v840_v35 = vpop.permute.xlu1 %839 }
0x1051   :  { %842 = vst.msk [vmem:[#allocation2 + $0x28] sm:$0xff] %vm88_vm1, %v840_v35  ;;  %2130 = vmatmul.mubr.msk.f32.vlgmr.msra.gmra.mrb[12].mxu0 %vm88_vm1, %v840_v35  ;;  %v1309_v35 = vld [vmem:[%s3250_s12 + $0x58] sm:$0xff] }
0x1052   :  { %2151 = vmatprep.mubr.msk.f32.mxu0 %vm2579_vm0, %v2580_v4  ;;  %2373 = vmatpush3.bf16.msra.mxu0 %v2372_v54 }
0x1053   :  { %2374 = vmatprep.subr.bf16.mxu0 %v2578_v0 }
0x1056   :  { %2376 = vmatpush3.bf16.msra.mxu0 %v2375_v57 }
0x1057   :  { %2386 = vmatprep.subr.bf16.mxu0 %v2385_v10 }
0x1058   :  { %v2942_v24 = vld [vmem:[#allocation2 + $0x28] sm:$0xff] }
0x1059   :  { %2152 = vmatmul.mubr.msk.f32.vlgmr.msra.gmra.mrb[14].mxu0 %vm88_vm1, %v2893_v58 }
0x105a   :  { %2388 = vmatpush3.bf16.msra.mxu0 %v2385_v10 }
0x105b   :  { %2390 = vmatprep.subr.bf16.mxu0 %v2389_v12 }
0x105e   :  { %2392 = vmatpush3.bf16.msra.mxu0 %v2389_v12 }
0x105f   :  { %2394 = vmatprep.subr.bf16.mxu0 %v2393_v27 }
0x1062   :  { %2396 = vmatpush3.bf16.msra.mxu0 %v2393_v27 }
0x1063   :  { %2398 = vmatprep.subr.bf16.mxu0 %v2397_v29 }
0x1066   :  { %2400 = vmatpush3.bf16.msra.mxu0 %v2397_v29 }
0x1067   :  { %2402 = vmatprep.subr.bf16.mxu0 %v2401_v5 }
0x106a   :  { %2404 = vmatpush3.bf16.msra.mxu0 %v2401_v5 }
0x1124   :  { %v911_v36 = vpop.f32.mrb[12].mxu0 }
0x1125   :  { %v912_v37 = vadd.f32 %v2743_v16, %v911_v36  ;;  %v2131_v38 = vpop.f32.mrb[13].mxu0 }
0x1126   :  { %v1311_v38 = vld [vmem:[%s3250_s12 + $0x68] sm:$0xff] }
0x1127   :  { %923 = vrot.lane.b32.xlu0 %v912_v37, %s2581_s26  ;;  %v915_v40 = vadd.f32 %v912_v37, %v210_v39  ;;  %v1310_v37 = vld [vmem:[%s3250_s12 + $0x60] sm:$0xff] }
0x1129   :  { %v1876_v41 = vmul.f32 -1.442695, %v915_v40  ;;  %v1312_v40 = vld [vmem:[%s3250_s12 + $0x70] sm:$0xff] }
0x112b   :  { %2528 = vpow2.f32 %v1876_v41  ;;  %v1313_v41 = vld [vmem:[%s3250_s12 + $0x78] sm:$0xff] }
0x112c   :  { %v1138_v32 = vpop.f32.mrb[14].mxu0 }
0x112d   :  { %v2153_v33 = vpop.f32.mrb[15].mxu0 }
0x112e   :  { %v1421_v33 = vld [vmem:[%s3253_s3 + $0x10] sm:$0xff] }
0x112f   :  { %vm1429_vm4 = vcmp.gt.f32.partialorder %v1421_v33, 0.0 }
0x1135   :  { %v2529_v42 = vpop.eup %2528 }
0x1136   :  { %v919_v43 = vadd.f32 1.0, %v2529_v42  ;;  %v2413_v42 = vpack.c.bf16 %v1313_v41, %v1312_v40  ;;  %v1423_v40 = vld [vmem:[%s3253_s3 + $0x20] sm:$0xff] }
0x1137   :  { %vm1431_vm6 = vcmp.gt.f32.partialorder %v1423_v40, 0.0 }
0x1138   :  { %2530 = vrcp.f32 %v919_v43 }
0x1142   :  { %v2531_v44 = vpop.eup %2530 }
0x1143   :  { %v933_v59 = vsub.f32 1.0, %v2531_v44  ;;  %v939_v61 = vmul.f32 %v2531_v44, %v837_v34  ;;  %v1308_v34 = vld [vmem:[%s3250_s12 + $0x50] sm:$0xff] }
0x1144   :  { %v2405_v36 = vpack.c.bf16 %v1309_v35, %v1308_v34 }
0x1146   :  { %2406 = vmatprep.subr.bf16.mxu0 %v2405_v36 }
0x1147   :  { %2408 = vmatpush3.bf16.msra.mxu0 %v2405_v36 }
0x1199   :  { %v924_v45 = vpop.permute.xlu0 %923 }
0x119a   :  { %v926_v46 = vmul.f32 %v2531_v44, %v924_v45 }
0x119c   :  { %928 = vrot.lane.b32.xlu1 %v926_v46, %s2581_s26  ;;  %v1879_v46 = vld [vmem:[%s3251_s9] ss:$0 sm:$0xff] }
0x120e   :  { %v929_v47 = vpop.permute.xlu1 %928 }
0x120f   :  { %v931_v48 = vadd.f32 %v929_v47, %v210_v39  ;;  %v2409_v39 = vpack.c.bf16 %v1311_v38, %v1310_v37  ;;  %v2995_v47 = vld [vmem:[%s3252_s11] ss:$0 sm:$0xff]  ;;  %v1422_v37 = vld [vmem:[%s3253_s3 + $0x18] sm:$0xff] }
0x1210   :  { %vm1430_vm5 = vcmp.gt.f32.partialorder %v1422_v37, 0.0 }
0x1211   :  { %2532 = vtanh.f32 %v931_v48  ;;  %2410 = vmatprep.subr.bf16.mxu0 %v2409_v39  ;;  %v2997_v48 = vadd.f32 %v1879_v46, %v1138_v32  ;;  %v1419_v32 = vld [vmem:[%s3253_s3] sm:$0xff] }
0x1212   :  { %2412 = vmatpush3.bf16.msra.mxu0 %v2409_v39  ;;  %vm1427_vm3 = vcmp.gt.f32.partialorder %v1419_v32, 0.0 }
0x1213   :  { %2414 = vmatprep.subr.bf16.mxu0 %v2413_v42 }
0x1216   :  { %2416 = vmatpush3.bf16.msra.mxu0 %v2413_v42 }
0x1217   :  { %2459 = vmatprep.subr.bf16.mxu0 %v2578_v0 }
0x121b   :  { %v2533_v51 = vpop.eup %2532 }
0x121c   :  { %935 = vrot.lane.b32.xlu0 %v2533_v51, %s2582_s29 }
0x128e   :  { %v936_v60 = vpop.permute.xlu0 %935 }
0x128f   :  { %v938_v62 = vmul.f32 %v936_v60, %v933_v59 }
0x1291   :  { %v2897_v63 = vadd.f32 %v939_v61, %v938_v62 }
0x1293   :  { %942 = vrot.lane.b32.xlu1 %v2897_v63, %s2582_s29 }
0x1305   :  { %v943_v17 = vpop.permute.xlu1 %942 }
0x1306   :  { %945 = vst.msk [vmem:[#allocation2 + $0x30] sm:$0xff] %vm88_vm1, %v943_v17  ;;  %2141 = vmatmul.mubr.msk.f32.vlgmr.msra.gmra.mrb[8].mxu1 %vm88_vm1, %v943_v17  ;;  %v215_v17 = vadd.f32 %v2800_v7, %v2750_v22 }
0x1307   :  { %2380 = vmatpush3.bf16.msra.mxu1 %v2377_v50  ;;  %2162 = vmatprep.mubr.msk.f32.mxu1 %vm88_vm1, %v2921_v18 }
0x1308   :  { %2382 = vmatprep.subr.bf16.mxu1 %v2381_v15 }
0x130b   :  { %2384 = vmatpush3.bf16.msra.mxu1 %v2381_v15 }
0x130c   :  { %2417 = vmatprep.subr.bf16.mxu1 %v2578_v0 }
0x130d   :  { %v2946_v9 = vld [vmem:[#allocation2 + $0x30] sm:$0xff] }
0x130e   :  { %2163 = vmatmul.mubr.msk.f32.vlgmr.msra.gmra.mrb[10].mxu1 %vm88_vm1, %v2926_v19 }
0x130f   :  { %2165 = vmatprep.mubr.msk.f32.mxu1 %vm88_vm1, %v2930_v20 }
0x1312   :  { %2166 = vmatmul.mubr.msk.f32.gmra.mrb[12].mxu1 %vm88_vm1, %v2934_v21 }
0x1313   :  { %2168 = vmatprep.mubr.msk.f32.mxu1 %vm88_vm1, %v2938_v23 }
0x1316   :  { %2169 = vmatmul.mubr.msk.f32.gmra.mrb[14].mxu1 %vm88_vm1, %v2942_v24 }
0x1317   :  { %2171 = vmatprep.mubr.msk.f32.mxu1 %vm88_vm1, %v2946_v9 }
0x13d9   :  { %v1014_v43 = vpop.f32.mrb[8].mxu1 }
0x13da   :  { %v1015_v44 = vadd.f32 %v2743_v16, %v1014_v43  ;;  %v2142_v45 = vpop.f32.mrb[9].mxu1  ;;  %v1424_v43 = vld [vmem:[%s3253_s3 + $0x28] sm:$0xff] }
0x13db   :  { %vm1432_vm7 = vcmp.gt.f32.partialorder %v1424_v43, 0.0 }
0x13dc   :  { %1026 = vrot.lane.b32.xlu0 %v1015_v44, %s2581_s26  ;;  %v1018_v25 = vadd.f32 %v1015_v44, %v215_v17 }
0x13de   :  { %v1878_v26 = vmul.f32 -1.442695, %v1018_v25 }
0x13e1   :  { %v2164_v49 = vpop.f32.mrb[10].mxu1 }
0x13e2   :  { %v1249_v8 = vadd.f32 %v2164_v49, %v2995_v47  ;;  %v1243_v50 = vpop.f32.mrb[11].mxu1 }
0x13e3   :  { %v1244_v16 = vadd.f32 %v2995_v47, %v1243_v50 }
0x13e4   :  { %v1283_v51 = vadd.f32 %v1249_v8, %v2997_v48 }
0x13e5   :  { %v1282_v52 = vadd.f32 %v1244_v16, %v2997_v48  ;;  %v2167_v53 = vpop.f32.mrb[12].mxu1 }
0x13e6   :  { %v1259_v54 = vadd.f32 %v2167_v53, %v2995_v47  ;;  %v1253_v55 = vpop.f32.mrb[13].mxu1 }
0x13e7   :  { %2534 = vtanh.f32 %v1282_v52  ;;  %v1254_v56 = vadd.f32 %v2995_v47, %v1253_v55 }
0x13e8   :  { %2536 = vtanh.f32 %v1283_v51  ;;  %v1285_v57 = vadd.f32 %v1259_v54, %v2997_v48 }
0x13e9   :  { %v1284_v59 = vadd.f32 %v1254_v56, %v2997_v48  ;;  %v2170_v60 = vpop.f32.mrb[14].mxu1 }
0x13ea   :  { %v1269_v61 = vadd.f32 %v2170_v60, %v2995_v47  ;;  %v1263_v62 = vpop.f32.mrb[15].mxu1 }
0x13eb   :  { %2538 = vtanh.f32 %v1284_v59  ;;  %v1264_v1 = vadd.f32 %v2995_v47, %v1263_v62 }
0x13ec   :  { %2540 = vtanh.f32 %v1285_v57  ;;  %v1287_v2 = vadd.f32 %v1269_v61, %v2997_v48 }
0x13ed   :  { %v1286_v3 = vadd.f32 %v1264_v1, %v2997_v48 }
0x13ef   :  { %2542 = vtanh.f32 %v1286_v3 }
0x13f0   :  { %2544 = vtanh.f32 %v1287_v2 }
0x13f1   :  { %v2535_v10 = vpop.eup %2534  ;;  %2546 = vpow2.f32 %v1878_v26 }
0x13f2   :  { %v2537_v11 = vpop.eup %2536  ;;  %2206 = vmatprep.mubr.f32.mxu0 %v2535_v10 }
0x13f3   :  { %2207 = vmatmul.mubr.f32.vlgmr.msra.gmra.mrb[16].mxu0 %v2537_v11 }
0x13f5   :  { %v2539_v12 = vpop.eup %2538 }
0x13f6   :  { %v2541_v6 = vpop.eup %2540  ;;  %2209 = vmatprep.mubr.f32.mxu0 %v2539_v12 }
0x13f7   :  { %2210 = vmatmul.mubr.f32.gmra.mrb[18].mxu0 %v2541_v6  ;;  %v2583_v6 = vmov 0  }
0x13f8   :  { %2491 = vset.pattern.permute.xlu1 %v2583_v6  ;;  %2490 = vset.pattern.permute.xlu0 %v2583_v6  ;;  %v1564_v6 = vld [vmem:[%s3254_s13 + $0x18] sm:$0xff] }
0x13f9   :  { %v2543_v13 = vpop.eup %2542 }
0x13fa   :  { %v2545_v15 = vpop.eup %2544  ;;  %2212 = vmatprep.mubr.f32.mxu0 %v2543_v13 }
0x13fb   :  { %2213 = vmatmul.mubr.f32.gmra.mrb[20].mxu0 %v2545_v15  ;;  %v2547_v27 = vpop.eup %2546 }
0x13fc   :  { %v1022_v28 = vadd.f32 1.0, %v2547_v27 }
0x13fe   :  { %2548 = vrcp.f32 %v1022_v28 }
0x1408   :  { %v2549_v14 = vpop.eup %2548 }
0x1409   :  { %v1036_v54 = vsub.f32 1.0, %v2549_v14  ;;  %v1042_v56 = vmul.f32 %v2549_v14, %v2897_v63 }
0x144e   :  { %v1027_v29 = vpop.permute.xlu0 %1026 }
0x144f   :  { %v1029_v30 = vmul.f32 %v2549_v14, %v1027_v29 }
0x1451   :  { %1031 = vrot.lane.b32.xlu1 %v1029_v30, %s2581_s26 }
0x14c3   :  { %v1032_v22 = vpop.permute.xlu1 %1031 }
0x14c4   :  { %v1034_v7 = vadd.f32 %v1032_v22, %v215_v17 }
0x14c6   :  { %2550 = vtanh.f32 %v1034_v7  ;;  %v2208_v5 = vpop.f32.mrb[16].mxu0 }
0x14c7   :  { %v3023_v34 = vsel %vm1428_vm2, %v2208_v5, -1e+09  ;;  %v1380_v35 = vpop.f32.mrb[17].mxu0 }
0x14c8   :  { %v3025_v36 = vsel %vm1427_vm3, %v1380_v35, -1e+09 }
0x14c9   :  { %v1443_v38 = vmax.f32 %v3025_v36, %v3023_v34 }
0x14ca   :  { %v2211_v39 = vpop.f32.mrb[18].mxu0 }
0x14cb   :  { %v1390_v41 = vpop.f32.mrb[19].mxu0  ;;  %v1438_v45 = vsel %vm1430_vm5, %v2211_v39, -1e+09 }
0x14cc   :  { %v1437_v42 = vsel %vm1429_vm4, %v1390_v41, -1e+09 }
0x14cd   :  { %v1444_v44 = vmax.f32 %v1443_v38, %v1437_v42 }
0x14ce   :  { %v2214_v46 = vpop.f32.mrb[20].mxu0 }
0x14cf   :  { %v1400_v49 = vpop.f32.mrb[21].mxu0  ;;  %v1445_v8 = vmax.f32 %v1444_v44, %v1438_v45  ;;  %v1440_v52 = vsel %vm1432_vm7, %v2214_v46, -1e+09 }
0x14d0   :  { %v2551_v50 = vpop.eup %2550  ;;  %v1439_v16 = vsel %vm1431_vm6, %v1400_v49, -1e+09 }
0x14d1   :  { %v1446_v51 = vmax.f32 %v1445_v8, %v1439_v16  ;;  %1038 = vrot.lane.b32.xlu0 %v2551_v50, %s2582_s29 }
0x14d3   :  { %v1447_v53 = vmax.f32 %v1446_v51, %v1440_v52 }
0x1543   :  { %v1039_v55 = vpop.permute.xlu0 %1038 }
0x1544   :  { %v1041_v57 = vmul.f32 %v1039_v55, %v1036_v54 }
0x1546   :  { %v1043_v59 = vadd.f32 %v1042_v56, %v1041_v57 }
0x1548   :  { %1045 = vrot.lane.b32.xlu1 %v1043_v59, %s2582_s29 }
0x15ba   :  { %v1046_v60 = vpop.permute.xlu1 %1045 }
0x15bb   :  { %1048 = vst.msk [vmem:[#allocation2 + $0x38] sm:$0xff] %vm88_vm1, %v1046_v60 }
0x15c2   :  { %v3042_v61 = vld [vmem:[#allocation2 + $0x38] sm:$0xff] }
0x15c3   :  { %2172 = vmatmul.mubr.msk.f32.gmra.mrb[16].mxu1 %vm88_vm1, %v3042_v61 }
0x15c4   :  { %2242 = vmatprep.mubr.msk.f32.mxu1 %vm2579_vm0, %v2580_v4 }
0x1696   :  { %v2173_v62 = vpop.f32.mrb[16].mxu1 }
0x1697   :  { %v1279_v1 = vadd.f32 %v2173_v62, %v2995_v47  ;;  %v1273_v2 = vpop.f32.mrb[17].mxu1 }
0x1698   :  { %v1274_v63 = vadd.f32 %v2995_v47, %v1273_v2  ;;  %v1425_v47 = vld [vmem:[%s3253_s3 + $0x30] sm:$0xff] }
0x1699   :  { %v1289_v3 = vadd.f32 %v1279_v1, %v2997_v48  ;;  %vm1433_vm8 = vcmp.gt.f32.partialorder %v1425_v47, 0.0 }
0x169a   :  { %v1288_v10 = vadd.f32 %v1274_v63, %v2997_v48  ;;  %v1426_v48 = vld [vmem:[%s3253_s3 + $0x38] sm:$0xff]  ;;  %s2584_s3 = smov 32  }
0x169b   :  { %vm1434_vm9 = vcmp.gt.f32.partialorder %v1426_v48, 0.0  ;;  %v1565_v48 = vld [vmem:[%s3254_s13 + $0x20] sm:$0xff] }
0x169c   :  { %2552 = vtanh.f32 %v1288_v10  ;;  %v1562_v10 = vld [vmem:[%s3254_s13 + $0x8] sm:$0xff] }
0x169d   :  { %2554 = vtanh.f32 %v1289_v3  ;;  %v1561_v3 = vld [vmem:[%s3254_s13] sm:$0xff] }
0x16a6   :  { %v2553_v11 = vpop.eup %2552 }
0x16a7   :  { %v2555_v12 = vpop.eup %2554  ;;  %2215 = vmatprep.mubr.f32.mxu0 %v2553_v11  ;;  %v1563_v11 = vld [vmem:[%s3254_s13 + $0x10] sm:$0xff] }
0x16a8   :  { %2216 = vmatmul.mubr.f32.gmra.mrb[22].mxu0 %v2555_v12  ;;  %v2418_v12 = vpack.c.bf16 %v1562_v10, %v1561_v3  ;;  %v2421_v47 = vpack.c.bf16 %v1564_v6, %v1563_v11  ;;  %v1667_v3 = vld [vmem:[%s3256_s15 + $0x60] sm:$0xff]  ;;  %v1668_v10 = vld [vmem:[%s3256_s15 + $0x68] sm:$0xff]  ;;  %v1670_v6 = vld [vmem:[%s3256_s15 + $0x78] sm:$0xff] }
0x16a9   :  { %2312 = vmatprep.mubr.msk.f32.mxu0 %vm2579_vm0, %v2580_v4  ;;  %v2454_v11 = vpack.c.bf16 %v1668_v10, %v1667_v3 }
0x16aa   :  { %2419 = vmatpush3.bf16.msra.mxu1 %v2418_v12  ;;  %v1669_v12 = vld [vmem:[%s3256_s15 + $0x70] sm:$0xff] }
0x16ab   :  { %2420 = vmatprep.subr.bf16.mxu1 %v2578_v0 }
0x16ae   :  { %2422 = vmatpush3.bf16.msra.mxu1 %v2421_v47  ;;  %v1749_v47 = vld [vmem:[%s3257_s17] sm:$0xff] }
0x16af   :  { %2423 = vmatprep.subr.bf16.mxu1 %v2578_v0 }
0x177b   :  { %v2217_v13 = vpop.f32.mrb[22].mxu0 }
0x177c   :  { %v1410_v15 = vpop.f32.mrb[23].mxu0  ;;  %v1442_v26 = vsel %vm1434_vm9, %v2217_v13, -1e+09  ;;  %v1566_v13 = vld [vmem:[%s3254_s13 + $0x28] sm:$0xff] }
0x177d   :  { %v1441_v17 = vsel %vm1433_vm8, %v1410_v15, -1e+09  ;;  %v2424_v15 = vpack.c.bf16 %v1566_v13, %v1565_v48  ;;  %v1750_v48 = vld [vmem:[%s3257_s17 + $0x8] sm:$0xff]  ;;  %v1751_v13 = vld [vmem:[%s3257_s17 + $0x10] sm:$0xff] }
0x177e   :  { %v1448_v25 = vmax.f32 %v1447_v53, %v1441_v17 }
0x177f   :  { %2425 = vmatpush3.bf16.msra.mxu1 %v2424_v15  ;;  %v2460_v15 = vpack.c.bf16 %v1750_v48, %v1749_v47 }
0x1780   :  { %v1449_v27 = vmax.f32 %v1448_v25, %v1442_v26  ;;  %v1568_v25 = vld [vmem:[%s3254_s13 + $0x38] sm:$0xff]  ;;  %2426 = vmatprep.subr.bf16.mxu1 %v2578_v0 }
0x1781   :  { %2461 = vmatpush3.bf16.msra.mxu0 %v2460_v15 }
0x1782   :  { %v1450_v28 = vsub.f32 %v3025_v36, %v1449_v27  ;;  %v1453_v14 = vsub.f32 %v3023_v34, %v1449_v27  ;;  %v1456_v29 = vsub.f32 %v1437_v42, %v1449_v27  ;;  %v1459_v30 = vsub.f32 %v1438_v45, %v1449_v27  ;;  %2462 = vmatprep.subr.bf16.mxu0 %v2578_v0 }
0x1783   :  { %v1462_v31 = vsub.f32 %v1439_v16, %v1449_v27  ;;  %v1465_v32 = vsub.f32 %v1440_v52, %v1449_v27  ;;  %v1468_v22 = vsub.f32 %v1441_v17, %v1449_v27  ;;  %v1471_v7 = vsub.f32 %v1442_v26, %v1449_v27  ;;  %v1567_v17 = vld [vmem:[%s3254_s13 + $0x30] sm:$0xff] }
0x1784   :  { %v1451_v5 = vmul.f32 1.442695, %v1450_v28  ;;  %v1454_v33 = vmul.f32 1.442695, %v1453_v14  ;;  %v1457_v35 = vmul.f32 1.442695, %v1456_v29  ;;  %v2427_v26 = vpack.c.bf16 %v1568_v25, %v1567_v17 }
0x1785   :  { %v1460_v37 = vmul.f32 1.442695, %v1459_v30  ;;  %v1463_v38 = vmul.f32 1.442695, %v1462_v31  ;;  %v1466_v39 = vmul.f32 1.442695, %v1465_v32 }
0x1786   :  { %2556 = vpow2.f32 %v1451_v5  ;;  %v1469_v36 = vmul.f32 1.442695, %v1468_v22  ;;  %v1472_v34 = vmul.f32 1.442695, %v1471_v7  ;;  %2428 = vmatpush3.bf16.msra.mxu1 %v2427_v26  ;;  %v1569_v7 = vld [vmem:[%s3254_s13 + $0x40] sm:$0xff]  ;;  %v1570_v5 = vld [vmem:[%s3254_s13 + $0x48] sm:$0xff] }
0x1787   :  { %2558 = vpow2.f32 %v1454_v33  ;;  %2429 = vmatprep.subr.bf16.mxu1 %v2578_v0  ;;  %v1571_v33 = vld [vmem:[%s3254_s13 + $0x50] sm:$0xff]  ;;  %v1752_v17 = vld [vmem:[%s3257_s17 + $0x18] sm:$0xff]  ;;  %v1753_v26 = vld [vmem:[%s3257_s17 + $0x20] sm:$0xff] }
0x1788   :  { %2560 = vpow2.f32 %v1457_v35  ;;  %v2430_v35 = vpack.c.bf16 %v1570_v5, %v1569_v7  ;;  %v2463_v25 = vpack.c.bf16 %v1752_v17, %v1751_v13  ;;  %v1759_v7 = vld [vmem:[%s3257_s17 + $0x50] sm:$0xff]  ;;  %v1760_v5 = vld [vmem:[%s3257_s17 + $0x58] sm:$0xff] }
0x1789   :  { %2562 = vpow2.f32 %v1460_v37 }
0x178a   :  { %2564 = vpow2.f32 %v1463_v38  ;;  %2431 = vmatpush3.bf16.msra.mxu1 %v2430_v35  ;;  %2464 = vmatpush3.bf16.msra.mxu0 %v2463_v25 }
0x178b   :  { %2566 = vpow2.f32 %v1466_v39  ;;  %2432 = vmatprep.subr.bf16.mxu1 %v2578_v0  ;;  %2465 = vmatprep.subr.bf16.mxu0 %v2578_v0 }
0x178c   :  { %2568 = vpow2.f32 %v1469_v36 }
0x178d   :  { %2570 = vpow2.f32 %v1472_v34 }
0x1790   :  { %v2557_v40 = vpop.eup %2556 }
0x1791   :  { %v2559_v41 = vpop.eup %2558 }
0x1792   :  { %v1474_v42 = vadd.f32 %v2559_v41, %v2557_v40  ;;  %v2561_v43 = vpop.eup %2560 }
0x1793   :  { %v2563_v45 = vpop.eup %2562 }
0x1794   :  { %v1475_v44 = vadd.f32 %v2561_v43, %v1474_v42  ;;  %v2565_v49 = vpop.eup %2564 }
0x1795   :  { %v2567_v50 = vpop.eup %2566 }
0x1796   :  { %v1476_v46 = vadd.f32 %v2563_v45, %v1475_v44  ;;  %v2569_v51 = vpop.eup %2568 }
0x1797   :  { %v2571_v53 = vpop.eup %2570 }
0x1798   :  { %v1477_v8 = vadd.f32 %v2565_v49, %v1476_v46 }
0x179a   :  { %v1478_v16 = vadd.f32 %v2567_v50, %v1477_v8 }
0x179c   :  { %v1479_v52 = vadd.f32 %v2569_v51, %v1478_v16  ;;  %v1658_v16 = vld [vmem:[%s3256_s15 + $0x18] sm:$0xff] }
0x179e   :  { %v1480_v54 = vadd.f32 %v2571_v53, %v1479_v52 }
0x17a0   :  { %2572 = vrcp.f32 %v1480_v54  ;;  %v1660_v54 = vld [vmem:[%s3256_s15 + $0x28] sm:$0xff] }
0x17aa   :  { %v2573_v55 = vpop.eup %2572 }
0x17ab   :  { %v1489_v56 = vmul.f32 %v2573_v55, %v2559_v41  ;;  %v1482_v57 = vmul.f32 %v2573_v55, %v2557_v40  ;;  %v1497_v59 = vmul.f32 %v2573_v55, %v2561_v43  ;;  %v1505_v60 = vmul.f32 %v2573_v55, %v2563_v45 }
0x17ac   :  { %v1513_v62 = vmul.f32 %v2573_v55, %v2565_v49  ;;  %v1521_v1 = vmul.f32 %v2573_v55, %v2567_v50  ;;  %v1529_v2 = vmul.f32 %v2573_v55, %v2569_v51  ;;  %v1537_v63 = vmul.f32 %v2573_v55, %v2571_v53  ;;  %v1659_v53 = vld [vmem:[%s3256_s15 + $0x20] sm:$0xff] }
0x17ad   :  { %1492 = vperm.xlu1 %2491, %v1489_v56   ;;  %1485 = vperm.xlu0 %2490, %v1482_v57   ;;  %v2442_v55 = vpack.c.bf16 %v1660_v54, %v1659_v53  ;;  %v1661_v56 = vld [vmem:[%s3256_s15 + $0x30] sm:$0xff] }
0x17b1   :  { %1500 = vperm.xlu1 %2491, %v1497_v59   ;;  %1508 = vperm.xlu0 %2490, %v1505_v60   ;;  %v1663_v59 = vld [vmem:[%s3256_s15 + $0x40] sm:$0xff]  ;;  %v1664_v60 = vld [vmem:[%s3256_s15 + $0x48] sm:$0xff] }
0x17b5   :  { %1516 = vperm.xlu1 %2491, %v1513_v62   ;;  %1524 = vperm.xlu0 %2490, %v1521_v1   ;;  %v2448_v62 = vpack.c.bf16 %v1664_v60, %v1663_v59  ;;  %v1665_v1 = vld [vmem:[%s3256_s15 + $0x50] sm:$0xff] }
0x17b9   :  { %1532 = vperm.xlu1 %2491, %v1529_v2   ;;  %1540 = vperm.xlu0 %2490, %v1537_v63   ;;  %v1666_v2 = vld [vmem:[%s3256_s15 + $0x58] sm:$0xff] }
0x17ba   :  { %v2451_v63 = vpack.c.bf16 %v1666_v2, %v1665_v1 }
0x17bd   :  { %1549 = vrot.lane.b32.xlu1 %v2893_v58, %s2584_s3  ;;  %v1545_v58 = vld [vmem:[%s3255_s1] sm:$0xff] }
0x17be   :  { %1546 = vst.msk [vmem:[#allocation3] sm:$0xff] %vm88_vm1, %v1545_v58  ;;  %v2457_v58 = vpack.c.bf16 %v1670_v6, %v1669_v12 }
0x182c   :  { %v1493_v27 = vpop.permute.xlu1 %1492  ;;  %v1486_v28 = vpop.permute.xlu0 %1485 }
0x182d   :  { %v1495_v14 = vmul.f32 %v1493_v27, %v2926_v19  ;;  %v1488_v29 = vmul.f32 %v1486_v28, %v2921_v18  ;;  %v1754_v27 = vld [vmem:[%s3257_s17 + $0x28] sm:$0xff] }
0x182e   :  { %v2466_v28 = vpack.c.bf16 %v1754_v27, %v1753_v26 }
0x182f   :  { %v1496_v32 = vadd.f32 %v1495_v14, %v1488_v29  ;;  %v1755_v14 = vld [vmem:[%s3257_s17 + $0x30] sm:$0xff]  ;;  %v1756_v29 = vld [vmem:[%s3257_s17 + $0x38] sm:$0xff] }
0x1830   :  { %v1501_v30 = vpop.permute.xlu1 %1500  ;;  %v1509_v31 = vpop.permute.xlu0 %1508  ;;  %2467 = vmatpush3.bf16.msra.mxu0 %v2466_v28 }
0x1831   :  { %v1503_v22 = vmul.f32 %v1501_v30, %v2930_v20  ;;  %v1511_v18 = vmul.f32 %v1509_v31, %v2934_v21  ;;  %v1572_v20 = vld [vmem:[%s3254_s13 + $0x58] sm:$0xff]  ;;  %v2469_v30 = vpack.c.bf16 %v1756_v29, %v1755_v14  ;;  %2468 = vmatprep.subr.bf16.mxu0 %v2578_v0  ;;  %v1757_v31 = vld [vmem:[%s3257_s17 + $0x40] sm:$0xff] }
0x1832   :  { %v2433_v34 = vpack.c.bf16 %v1572_v20, %v1571_v33  ;;  %v2475_v33 = vpack.c.bf16 %v1760_v5, %v1759_v7  ;;  %v1890_v20 = vld [vmem:[%s3258_s14] ss:$0 sm:$0xff] }
0x1833   :  { %v1504_v19 = vadd.f32 %v1503_v22, %v1496_v32  ;;  %v1758_v32 = vld [vmem:[%s3257_s17 + $0x48] sm:$0xff] }
0x1834   :  { %v1517_v37 = vpop.permute.xlu1 %1516  ;;  %v1525_v38 = vpop.permute.xlu0 %1524  ;;  %2434 = vmatpush3.bf16.msra.mxu1 %v2433_v34  ;;  %2470 = vmatpush3.bf16.msra.mxu0 %v2469_v30  ;;  %v2472_v22 = vpack.c.bf16 %v1758_v32, %v1757_v31  ;;  %v1763_v34 = vld [vmem:[%s3257_s17 + $0x70] sm:$0xff] }
0x1835   :  { %v1512_v39 = vadd.f32 %v1511_v18, %v1504_v19  ;;  %v1519_v36 = vmul.f32 %v1517_v37, %v2938_v23  ;;  %v1527_v41 = vmul.f32 %v1525_v38, %v2942_v24  ;;  %2435 = vmatprep.subr.bf16.mxu1 %v2578_v0  ;;  %v1655_v24 = vld [vmem:[%s3256_s15] sm:$0xff]  ;;  %2471 = vmatprep.subr.bf16.mxu0 %v2578_v0  ;;  %v1762_v18 = vld [vmem:[%s3257_s17 + $0x68] sm:$0xff] }
0x1836   :  { %v1761_v19 = vld [vmem:[%s3257_s17 + $0x60] sm:$0xff] }
0x1837   :  { %v1520_v40 = vadd.f32 %v1519_v36, %v1512_v39  ;;  %v2478_v35 = vpack.c.bf16 %v1762_v18, %v1761_v19 }
0x1838   :  { %v1533_v42 = vpop.permute.xlu1 %1532  ;;  %v1541_v43 = vpop.permute.xlu0 %1540  ;;  %2473 = vmatpush3.bf16.msra.mxu0 %v2472_v22 }
0x1839   :  { %v1528_v21 = vadd.f32 %v1527_v41, %v1520_v40  ;;  %v1535_v44 = vmul.f32 %v1533_v42, %v2946_v9  ;;  %v1543_v46 = vmul.f32 %v1541_v43, %v3042_v61  ;;  %v1656_v9 = vld [vmem:[%s3256_s15 + $0x8] sm:$0xff]  ;;  %v1657_v61 = vld [vmem:[%s3256_s15 + $0x10] sm:$0xff]  ;;  %2474 = vmatprep.subr.bf16.mxu0 %v2578_v0  ;;  %v1764_v40 = vld [vmem:[%s3257_s17 + $0x78] sm:$0xff] }
0x183a   :  { %v2436_v50 = vpack.c.bf16 %v1656_v9, %v1655_v24  ;;  %v2439_v52 = vpack.c.bf16 %v1658_v16, %v1657_v61  ;;  %v2481_v41 = vpack.c.bf16 %v1764_v40, %v1763_v34  ;;  %v1892_v42 = vld [vmem:[%s3260_s16] ss:$0 sm:$0xff] }
0x183b   :  { %v1536_v45 = vadd.f32 %v1535_v44, %v1528_v21 }
0x183c   :  { %v1550_v23 = vpop.permute.xlu1 %1549  ;;  %2476 = vmatpush3.bf16.msra.mxu0 %v2475_v33 }
0x183d   :  { %v1544_v49 = vadd.f32 %v1543_v46, %v1536_v45  ;;  %1553 = vst.msk [vmem:[#allocation3] sm:$0xff] %vm1552_vm10, %v1550_v23  ;;  %2477 = vmatprep.subr.bf16.mxu0 %v2578_v0 }
0x183f   :  { %1555 = vrot.lane.b32.xlu0 %v1544_v49, %s2581_s26 }
0x1840   :  { %2479 = vmatpush3.bf16.msra.mxu0 %v2478_v35 }
0x1841   :  { %2480 = vmatprep.subr.bf16.mxu0 %v2578_v0 }
0x1844   :  { %2482 = vmatpush3.bf16.msra.mxu0 %v2481_v41 }
0x18b1   :  { %v1556_v8 = vpop.permute.xlu0 %1555 }
0x18b2   :  { %1559 = vst.msk [vmem:[#allocation3] sm:$0xff] %vm1558_vm11, %v1556_v8 }
0x18b9   :  { %v1560_v51 = vld [vmem:[#allocation3] sm:$0xff] }
0x18ba   :  { %2243 = vmatmul.mubr.msk.f32.vlgmr.msra.gmra.mrb[18].mxu1 %vm1580_vm12, %v1560_v51 }
0x18bb   :  { %2437 = vmatpush3.bf16.msra.mxu1 %v2436_v50  ;;  %2277 = vmatprep.mubr.msk.f32.mxu1 %vm2579_vm0, %v2580_v4  ;;  %v1662_v4 = vld [vmem:[%s3256_s15 + $0x38] sm:$0xff] }
0x18bc   :  { %2438 = vmatprep.subr.bf16.mxu1 %v2578_v0  ;;  %v2445_v57 = vpack.c.bf16 %v1662_v4, %v1661_v56 }
0x18bf   :  { %2440 = vmatpush3.bf16.msra.mxu1 %v2439_v52 }
0x18c0   :  { %2441 = vmatprep.subr.bf16.mxu1 %v2578_v0 }
0x18c3   :  { %2443 = vmatpush3.bf16.msra.mxu1 %v2442_v55 }
0x18c4   :  { %2444 = vmatprep.subr.bf16.mxu1 %v2578_v0 }
0x18c7   :  { %2446 = vmatpush3.bf16.msra.mxu1 %v2445_v57 }
0x18c8   :  { %2447 = vmatprep.subr.bf16.mxu1 %v2578_v0 }
0x18cb   :  { %2449 = vmatpush3.bf16.msra.mxu1 %v2448_v62 }
0x18cc   :  { %2450 = vmatprep.subr.bf16.mxu1 %v2578_v0 }
0x18cf   :  { %2452 = vmatpush3.bf16.msra.mxu1 %v2451_v63 }
0x18d0   :  { %2453 = vmatprep.subr.bf16.mxu1 %v2578_v0 }
0x18d3   :  { %2455 = vmatpush3.bf16.msra.mxu1 %v2454_v11 }
0x18d4   :  { %2456 = vmatprep.subr.bf16.mxu1 %v2578_v0  ;;  %v24_v0 = vstv %s3259_s18 }
0x18d5   :  { %25 = vst [vmem:[#allocation4] sm:$0x1] %v24_v0 }
0x18d7   :  { %2458 = vmatpush3.bf16.msra.mxu1 %v2457_v58 }
0x18dc   :  { %v1893_v46 = vld [vmem:[#allocation4] ss:$0 sm:$0xff] }
0x198d   :  { %v1650_v37 = vpop.f32.mrb[18].mxu1 }
0x198e   :  { %v1651_v38 = vadd.f32 %v1890_v20, %v1650_v37  ;;  %v2244_v39 = vpop.f32.mrb[19].mxu1 }
0x1990   :  { %v1654_v36 = vmax.f32 %v1651_v38, 0.0 }
0x1992   :  { %2278 = vmatmul.mubr.f32.vlgmr.msra.gmra.mrb[20].mxu1 %v1654_v36 }
0x1a65   :  { %v1744_v43 = vpop.f32.mrb[20].mxu1 }
0x1a66   :  { %v1745_v21 = vadd.f32 %v1892_v42, %v1744_v43  ;;  %v2279_v44 = vpop.f32.mrb[21].mxu1 }
0x1a68   :  { %v1748_v45 = vmax.f32 %v1745_v21, 0.0 }
0x1a6a   :  { %2313 = vmatmul.mubr.f32.vlgmr.msra.gmra.mrb[24].mxu0 %v1748_v45 }
0x1b3d   :  { %v1838_v23 = vpop.f32.mrb[24].mxu0 }
0x1b3e   :  { %v1839_v49 = vadd.f32 %v1893_v46, %v1838_v23  ;;  %v2314_v8 = vpop.f32.mrb[25].mxu0 }
0x1b40   :  { %v1894_v24 = vmul.f32 -1.442695, %v1839_v49 }
0x1b42   :  { %2574 = vpow2.f32 %v1894_v24 }
0x1b4c   :  { %v2575_v9 = vpop.eup %2574 }
0x1b4d   :  { %v1845_v50 = vadd.f32 1.0, %v2575_v9 }
0x1b4f   :  { %2576 = vrcp.f32 %v1845_v50 }
0x1b59   :  { %v2577_v61 = vpop.eup %2576 }
0x1b5a   :  { %1849 = vst.msk [vmem:[%s3261_s19] sm:$0xff] %vm1848_vm13, %v2577_v61 }

</bundles_post_ra>
